<compile_context>
chip_gen: v7x
topology: tpu7x:2x2x1
jax: 0.10.0
libtpu: 0.0.40
codegen_flags: <defaults>
</compile_context>

<pallas_src>
import functools
import math

import jax
import jax.numpy as jnp
from jax import lax
from jax.experimental import pallas as pl
from jax.experimental.pallas import tpu as pltpu

NEG_INF = -1e30   # finite additive-mask fill (kept f32; exp underflows to exactly 0)


def _device_kind():
    try:
        return jax.devices()[0].device_kind.lower()
    except Exception:
        return ""


_KIND = _device_kind()
if ("v5" in _KIND) or ("v6" in _KIND):      # 128 MiB VMEM parts: bigger tiles, big tk
    TM, TN, TK = 512, 512, 1024
else:                                        # v7x (64 MiB VMEM) and unknown: conservative
    TM, TN, TK = 256, 256, 512

VMEM_LIMIT = 48 * 1024 * 1024                # raise scoped VMEM above the 16/32 MiB default


def _round_up(x, m):
    return (x + m - 1) // m * m


def _pad_axis(a, axis, target, value=0.0):
    pad = target - a.shape[axis]
    if pad == 0:
        return a                              # Python-level early-out: no XLA pad op
    widths = [(0, 0)] * a.ndim
    widths[axis] = (0, pad)
    return jnp.pad(a, widths, constant_values=value)


# ----------------------------------------------------------------------------
# Tiled linear (+ bias, optional ReLU) — bf16 MXU operands, f32 accumulate
# ----------------------------------------------------------------------------
def _linear_kernel(x_ref, w_ref, b_ref, o_ref, acc_ref, *, activation):
    k = pl.program_id(2)

    @pl.when(k == 0)
    def _():
        acc_ref[...] = jnp.zeros_like(acc_ref)

    acc_ref[...] += jnp.dot(
        x_ref[...].astype(jnp.bfloat16),
        w_ref[...].astype(jnp.bfloat16),
        preferred_element_type=jnp.float32)

    @pl.when(k == pl.num_programs(2) - 1)
    def _():
        y = acc_ref[...] + b_ref[...]
        if activation == "relu":
            y = jnp.maximum(y, 0.0)
        o_ref[...] = y.astype(o_ref.dtype)


def pallas_linear(x, w, b, activation=None, out_dtype=jnp.bfloat16,
                  tm=TM, tn=TN, tk=TK):
    """x:(M,K) @ w:(K,Np) + b:(Np,).  Weights are pre-padded to lane-dense Np
    (multiple of 128) in make_params, so the pads below are no-ops per step.
    Returns the (M, Np) result in out_dtype (callers slice logical columns)."""
    M, K = x.shape
    Kw, Np = w.shape
    KK = max(K, Kw)
    tm = M if M <= tm else tm
    tk = KK if KK <= tk else tk
    tn = Np if Np <= tn else tn
    Mp = _round_up(M, tm)
    Kp = _round_up(KK, tk)
    Npp = _round_up(Np, tn)

    xp = _pad_axis(_pad_axis(x, 0, Mp), 1, Kp)
    wp = _pad_axis(_pad_axis(w, 0, Kp), 1, Npp)
    bp = _pad_axis(b.reshape(1, Np), 1, Npp)

    out = pl.pallas_call(
        functools.partial(_linear_kernel, activation=activation),
        out_shape=jax.ShapeDtypeStruct((Mp, Npp), out_dtype),
        grid=(Mp // tm, Npp // tn, Kp // tk),
        in_specs=[
            pl.BlockSpec((tm, tk), lambda i, j, k: (i, k)),
            pl.BlockSpec((tk, tn), lambda i, j, k: (k, j)),
            pl.BlockSpec((1, tn), lambda i, j, k: (0, j)),
        ],
        out_specs=pl.BlockSpec((tm, tn), lambda i, j, k: (i, j)),
        scratch_shapes=[pltpu.VMEM((tm, tn), jnp.float32)],
        compiler_params=pltpu.CompilerParams(
            dimension_semantics=("parallel", "parallel", "arbitrary"),
            vmem_limit_bytes=VMEM_LIMIT),
    )(xp, wp, bp)
    if Mp != M or Npp != Np:
        out = out[:M, :Np]
    return out


# ----------------------------------------------------------------------------
# Tiled linear fused with residual-add + LayerNorm epilogue (out-proj / FFN-2)
# ----------------------------------------------------------------------------
def _linear_add_ln_kernel(x_ref, w_ref, b_ref, r_ref, g_ref, bt_ref, o_ref,
                          acc_ref, *, eps):
    k = pl.program_id(1)

    @pl.when(k == 0)
    def _():
        acc_ref[...] = jnp.zeros_like(acc_ref)

    acc_ref[...] += jnp.dot(
        x_ref[...].astype(jnp.bfloat16),
        w_ref[...].astype(jnp.bfloat16),
        preferred_element_type=jnp.float32)

    @pl.when(k == pl.num_programs(1) - 1)
    def _():
        y = acc_ref[...] + b_ref[...] + r_ref[...]      # matmul + bias + residual (f32)
        mean = jnp.mean(y, axis=-1, keepdims=True)
        var = jnp.mean(jnp.square(y - mean), axis=-1, keepdims=True)
        yn = (y - mean) * lax.rsqrt(var + eps)
        o_ref[...] = (yn * g_ref[...] + bt_ref[...]).astype(o_ref.dtype)


def pallas_linear_add_ln(x, w, b, residual, gamma, beta, eps=1e-5, tm=TM, tk=TK):
    """LayerNorm((x @ w + b) + residual); N = D kept in one block (LN axis).
    x may be bf16 (attention output / FFN hidden); residual stream stays f32."""
    M, K = x.shape
    D = w.shape[1]
    tm = M if M <= tm else tm
    tk = K if K <= tk else tk
    Mp = _round_up(M, tm)
    Kp = _round_up(K, tk)

    xp = _pad_axis(_pad_axis(x, 0, Mp), 1, Kp)
    wp = _pad_axis(w, 0, Kp)
    rp = _pad_axis(residual, 0, Mp)

    out = pl.pallas_call(
        functools.partial(_linear_add_ln_kernel, eps=eps),
        out_shape=jax.ShapeDtypeStruct((Mp, D), jnp.float32),
        grid=(Mp // tm, Kp // tk),
        in_specs=[
            pl.BlockSpec((tm, tk), lambda i, k: (i, k)),
            pl.BlockSpec((tk, D), lambda i, k: (k, 0)),
            pl.BlockSpec((1, D), lambda i, k: (0, 0)),
            pl.BlockSpec((tm, D), lambda i, k: (i, 0)),
            pl.BlockSpec((1, D), lambda i, k: (0, 0)),
            pl.BlockSpec((1, D), lambda i, k: (0, 0)),
        ],
        out_specs=pl.BlockSpec((tm, D), lambda i, k: (i, 0)),
        scratch_shapes=[pltpu.VMEM((tm, D), jnp.float32)],
        compiler_params=pltpu.CompilerParams(
            dimension_semantics=("parallel", "arbitrary"),
            vmem_limit_bytes=VMEM_LIMIT),
    )(xp, wp, b.reshape(1, D), rp, gamma.reshape(1, D), beta.reshape(1, D))
    if Mp != M:
        out = out[:M]
    return out


# ----------------------------------------------------------------------------
# Plain LayerNorm (no residual) — encoder/decoder final norms
# ----------------------------------------------------------------------------
def _layernorm_kernel(x_ref, g_ref, b_ref, o_ref, *, eps):
    x = x_ref[...]
    mean = jnp.mean(x, axis=-1, keepdims=True)
    var = jnp.mean(jnp.square(x - mean), axis=-1, keepdims=True)
    yn = (x - mean) * lax.rsqrt(var + eps)
    o_ref[...] = (yn * g_ref[...] + b_ref[...]).astype(o_ref.dtype)


def pallas_layernorm(x, gamma, beta, eps=1e-5, tm=TM):
    M, D = x.shape
    tm = M if M <= tm else tm
    Mp = _round_up(M, tm)
    xp = _pad_axis(x, 0, Mp)
    out = pl.pallas_call(
        functools.partial(_layernorm_kernel, eps=eps),
        out_shape=jax.ShapeDtypeStruct((Mp, D), jnp.float32),
        grid=(Mp // tm,),
        in_specs=[
            pl.BlockSpec((tm, D), lambda i: (i, 0)),
            pl.BlockSpec((1, D), lambda i: (0, 0)),
            pl.BlockSpec((1, D), lambda i: (0, 0)),
        ],
        out_specs=pl.BlockSpec((tm, D), lambda i: (i, 0)),
        compiler_params=pltpu.CompilerParams(
            dimension_semantics=("parallel",),
            vmem_limit_bytes=VMEM_LIMIT),
    )(xp, gamma.reshape(1, D), beta.reshape(1, D))
    if Mp != M:
        out = out[:M]
    return out


# ----------------------------------------------------------------------------
# Flash-style multi-head attention: grid (B, H, q-blocks, kv-blocks),
# online softmax state in VMEM scratch, in-kernel causal mask, bf16 in/out.
# ----------------------------------------------------------------------------
def _flash_attn_kernel(q_ref, k_ref, v_ref, kpb_ref, o_ref,
                       m_sc, l_sc, acc_sc, *, causal, scale, tq, tkv):
    ki = pl.program_id(3)

    @pl.when(ki == 0)
    def _():
        m_sc[...] = jnp.full_like(m_sc, -jnp.inf)
        l_sc[...] = jnp.zeros_like(l_sc)
        acc_sc[...] = jnp.zeros_like(acc_sc)

    # fold 1/sqrt(hd) into q — O(tq*hd) instead of scaling the (tq,tkv) scores
    q = (q_ref[0, 0].astype(jnp.float32) * scale).astype(jnp.bfloat16)
    s = lax.dot_general(q, k_ref[0, 0], (((1,), (1,)), ((), ())),
                        preferred_element_type=jnp.float32)     # (tq, tkv) f32
    s = s + kpb_ref[0]                                          # key-padding bias (1,tkv)
    if causal:
        row = pl.program_id(2) * tq + lax.broadcasted_iota(jnp.int32, (tq, tkv), 0)
        col = ki * tkv + lax.broadcasted_iota(jnp.int32, (tq, tkv), 1)
        s = jnp.where(col > row, jnp.float32(NEG_INF), s)

    m_prev = m_sc[...]
    m_new = jnp.maximum(m_prev, jnp.max(s, axis=-1, keepdims=True))
    alpha = jnp.exp(m_prev - m_new)
    p = jnp.exp(s - m_new)
    l_sc[...] = alpha * l_sc[...] + jnp.sum(p, axis=-1, keepdims=True)
    acc_sc[...] = alpha * acc_sc[...] + jnp.dot(
        p.astype(jnp.bfloat16), v_ref[0, 0], preferred_element_type=jnp.float32)
    m_sc[...] = m_new

    @pl.when(ki == pl.num_programs(3) - 1)
    def _():
        o_ref[0, 0] = (acc_sc[...] * pl.reciprocal(l_sc[...], approx=True)
                       ).astype(o_ref.dtype)


def _attn_blocks(L, max_block=128):
    if L <= max_block:
        t = _round_up(max(L, 8), 8)
    else:
        t = max_block
    return t, _round_up(L, t)


def pallas_mha(q, k, v, kp_bias, nhead, *, causal):
    """q:(B,Lq,D) bf16; k,v:(B,Lk,D) bf16; kp_bias:(B,1,Lk) f32 additive bias."""
    B, Lq, D = q.shape
    Lk = k.shape[1]
    hd = D // nhead
    scale = 1.0 / math.sqrt(hd)

    tq, Lqp = _attn_blocks(Lq)
    tkv, Lkp = _attn_blocks(Lk)

    def heads(x, Lp):
        x = _pad_axis(x, 1, Lp)
        return x.reshape(B, Lp, nhead, hd).transpose(0, 2, 1, 3)   # (B,H,Lp,hd)

    qh, kh, vh = heads(q, Lqp), heads(k, Lkp), heads(v, Lkp)
    kpb = _pad_axis(kp_bias, 2, Lkp, value=NEG_INF)                # mask padded keys

    out = pl.pallas_call(
        functools.partial(_flash_attn_kernel, causal=causal, scale=scale,
                          tq=tq, tkv=tkv),
        out_shape=jax.ShapeDtypeStruct((B, nhead, Lqp, hd), jnp.bfloat16),
        grid=(B, nhead, Lqp // tq, Lkp // tkv),
        in_specs=[
            pl.BlockSpec((1, 1, tq, hd), lambda b, h, qi, ki: (b, h, qi, 0)),
            pl.BlockSpec((1, 1, tkv, hd), lambda b, h, qi, ki: (b, h, ki, 0)),
            pl.BlockSpec((1, 1, tkv, hd), lambda b, h, qi, ki: (b, h, ki, 0)),
            pl.BlockSpec((1, 1, tkv), lambda b, h, qi, ki: (b, 0, ki)),
        ],
        out_specs=pl.BlockSpec((1, 1, tq, hd), lambda b, h, qi, ki: (b, h, qi, 0)),
        scratch_shapes=[pltpu.VMEM((tq, 1), jnp.float32),
                        pltpu.VMEM((tq, 1), jnp.float32),
                        pltpu.VMEM((tq, hd), jnp.float32)],
        compiler_params=pltpu.CompilerParams(
            dimension_semantics=("parallel", "parallel", "parallel", "arbitrary"),
            vmem_limit_bytes=VMEM_LIMIT),
    )(qh, kh, vh, kpb)

    out = out.transpose(0, 2, 1, 3).reshape(B, Lqp, D)             # merge heads (XLA)
    if Lqp != Lq:
        out = out[:, :Lq]
    return out


# ----------------------------------------------------------------------------
# Model glue (plain JAX): embedding gather, positional encoding, layer wiring
# ----------------------------------------------------------------------------
def positional_encoding_table(max_len, emb_size):
    position = jnp.arange(max_len, dtype=jnp.float32)[:, None]
    div_term = jnp.exp(jnp.arange(0, emb_size, 2, dtype=jnp.float32)
                       * -(math.log(10000.0) / emb_size))
    pe = jnp.zeros((max_len, emb_size), dtype=jnp.float32)
    pe = pe.at[:, 0::2].set(jnp.sin(position * div_term))
    pe = pe.at[:, 1::2].set(jnp.cos(position * div_term))
    return pe


def embed(tokens, table, pe):
    D = table.shape[1]
    x = jnp.take(table, tokens, axis=0) * jnp.float32(math.sqrt(D))
    return x + pe[None, : tokens.shape[1], :]


def _kp_bias(padding_mask):
    # (B, L) bool True=ignore  ->  (B, 1, L) f32 additive bias
    return jnp.where(padding_mask, jnp.float32(NEG_INF), jnp.float32(0.0))[:, None, :]


def encoder_layer(x, p, src_kpb, nhead):
    B, S, D = x.shape
    x2d = x.reshape(B * S, D)
    qkv = pallas_linear(x2d, p["sa_wqkv"], p["sa_bqkv"]).reshape(B, S, -1)   # bf16
    q, k, v = qkv[..., :D], qkv[..., D:2 * D], qkv[..., 2 * D:3 * D]
    a = pallas_mha(q, k, v, src_kpb, nhead, causal=False)                    # bf16
    x2d = pallas_linear_add_ln(a.reshape(B * S, D), p["sa_wo"], p["sa_bo"],
                               x2d, p["norm1_g"], p["norm1_b"])
    h = pallas_linear(x2d, p["ff_w1"], p["ff_b1"], activation="relu")        # bf16, FFp
    x2d = pallas_linear_add_ln(h, p["ff_w2"], p["ff_b2"],
                               x2d, p["norm2_g"], p["norm2_b"])
    return x2d.reshape(B, S, D)


def decoder_layer(x, memory, p, tgt_kpb, mem_kpb, nhead):
    B, T, D = x.shape
    S = memory.shape[1]
    x2d = x.reshape(B * T, D)
    m2d = memory.reshape(B * S, D)
    # self-attention (causal)
    qkv = pallas_linear(x2d, p["sa_wqkv"], p["sa_bqkv"]).reshape(B, T, -1)
    q, k, v = qkv[..., :D], qkv[..., D:2 * D], qkv[..., 2 * D:3 * D]
    a = pallas_mha(q, k, v, tgt_kpb, nhead, causal=True)
    x2d = pallas_linear_add_ln(a.reshape(B * T, D), p["sa_wo"], p["sa_bo"],
                               x2d, p["norm1_g"], p["norm1_b"])
    # cross-attention
    cq = pallas_linear(x2d, p["ca_wq"], p["ca_bq"]).reshape(B, T, -1)[..., :D]
    kv = pallas_linear(m2d, p["ca_wkv"], p["ca_bkv"]).reshape(B, S, -1)
    ck, cv = kv[..., :D], kv[..., D:2 * D]
    c = pallas_mha(cq, ck, cv, mem_kpb, nhead, causal=False)
    x2d = pallas_linear_add_ln(c.reshape(B * T, D), p["ca_wo"], p["ca_bo"],
                               x2d, p["norm2_g"], p["norm2_b"])
    # FFN
    h = pallas_linear(x2d, p["ff_w1"], p["ff_b1"], activation="relu")
    x2d = pallas_linear_add_ln(h, p["ff_w2"], p["ff_b2"],
                               x2d, p["norm3_g"], p["norm3_b"])
    return x2d.reshape(B, T, D)


def seq2seq_transformer_forward(params, src, trg, src_mask, tgt_mask,
                                src_padding_mask, tgt_padding_mask,
                                memory_key_padding_mask, *, nhead, tgt_vocab):
    # TODO(synk): src_mask / tgt_mask accepted for interface parity but assumed to be the
    # standard zero src mask and causal tgt mask (built in-kernel); arbitrary masks unsupported.
    B, S = src.shape
    _, T = trg.shape
    D = params["src_emb"].shape[1]

    src_x = embed(src, params["src_emb"], params["pe"])
    tgt_x = embed(trg, params["tgt_emb"], params["pe"])

    src_kpb = _kp_bias(src_padding_mask)
    tgt_kpb = _kp_bias(tgt_padding_mask)
    mem_kpb = _kp_bias(memory_key_padding_mask)

    memory = src_x
    for lp in params["encoder_layers"]:
        memory = encoder_layer(memory, lp, src_kpb, nhead)
    memory = pallas_layernorm(memory.reshape(B * S, D),
                              params["enc_norm_g"], params["enc_norm_b"]).reshape(B, S, D)

    out = tgt_x
    for lp in params["decoder_layers"]:
        out = decoder_layer(out, memory, lp, tgt_kpb, mem_kpb, nhead)
    out2d = pallas_layernorm(out.reshape(B * T, D),
                             params["dec_norm_g"], params["dec_norm_b"])

    logits = pallas_linear(out2d, params["gen_w"], params["gen_b"],
                           out_dtype=jnp.float32)[:, :tgt_vocab]
    return logits.reshape(B, T, tgt_vocab)


# ----------------------------------------------------------------------------
# Parameter construction: weights pre-padded (lane-dense N / padded FF K) + bf16,
# done ONCE here so the per-step wrapper pads are no-ops.
# ----------------------------------------------------------------------------
def _dense(key, d_in, d_out, *, k_pad=None, n_pad=True, scale=0.02):
    kp = d_in if k_pad is None else k_pad
    n_out = _round_up(d_out, 128) if n_pad else d_out
    w_core = (jax.random.normal(key, (d_in, d_out), jnp.float32) * scale
              ).astype(jnp.bfloat16)
    w = jnp.pad(w_core, ((0, kp - d_in), (0, n_out - d_out)))
    b = jnp.zeros((n_out,), jnp.float32)
    return w, b


def _self_mha_params(key, D):
    k1, k2 = jax.random.split(key)
    wqkv, bqkv = _dense(k1, D, 3 * D, n_pad=True)        # fused Q/K/V projection
    wo, bo = _dense(k2, D, D, n_pad=False)                # out-proj feeds LN (N = D exact)
    return dict(sa_wqkv=wqkv, sa_bqkv=bqkv, sa_wo=wo, sa_bo=bo)


def _cross_mha_params(key, D):
    k1, k2, k3 = jax.random.split(key, 3)
    wq, bq = _dense(k1, D, D, n_pad=True)
    wkv, bkv = _dense(k2, D, 2 * D, n_pad=True)           # fused K/V projection of memory
    wo, bo = _dense(k3, D, D, n_pad=False)
    return dict(ca_wq=wq, ca_bq=bq, ca_wkv=wkv, ca_bkv=bkv, ca_wo=wo, ca_bo=bo)


def _ffn_params(key, D, F):
    k1, k2 = jax.random.split(key)
    Fp = _round_up(F, 128)
    w1, b1 = _dense(k1, D, F, n_pad=True)                 # hidden padded to Fp
    w2, b2 = _dense(k2, F, D, k_pad=Fp, n_pad=False)      # K pre-padded to Fp (zero rows)
    return dict(ff_w1=w1, ff_b1=b1, ff_w2=w2, ff_b2=b2)


def _ln_params(D):
    return jnp.ones((D,), jnp.float32), jnp.zeros((D,), jnp.float32)


def make_params(key, num_enc, num_dec, D, F, src_vocab, tgt_vocab, max_len=5000):
    keys = jax.random.split(key, 8)
    params = {}
    params["src_emb"] = jax.random.normal(keys[0], (src_vocab, D), jnp.float32) * 0.02
    params["tgt_emb"] = jax.random.normal(keys[1], (tgt_vocab, D), jnp.float32) * 0.02
    params["pe"] = positional_encoding_table(max_len, D)

    enc_layers = []
    for i in range(num_enc):
        lk = jax.random.fold_in(keys[2], i)
        k1, k2 = jax.random.split(lk)
        g1, b1 = _ln_params(D)
        g2, b2 = _ln_params(D)
        lp = dict(norm1_g=g1, norm1_b=b1, norm2_g=g2, norm2_b=b2)
        lp.update(_self_mha_params(k1, D))
        lp.update(_ffn_params(k2, D, F))
        enc_layers.append(lp)
    params["encoder_layers"] = enc_layers

    dec_layers = []
    for i in range(num_dec):
        lk = jax.random.fold_in(keys[3], i)
        k1, k2, k3 = jax.random.split(lk, 3)
        g1, b1 = _ln_params(D)
        g2, b2 = _ln_params(D)
        g3, b3 = _ln_params(D)
        lp = dict(norm1_g=g1, norm1_b=b1, norm2_g=g2, norm2_b=b2, norm3_g=g3, norm3_b=b3)
        lp.update(_self_mha_params(k1, D))
        lp.update(_cross_mha_params(k2, D))
        lp.update(_ffn_params(k3, D, F))
        dec_layers.append(lp)
    params["decoder_layers"] = dec_layers

    params["enc_norm_g"], params["enc_norm_b"] = _ln_params(D)
    params["dec_norm_g"], params["dec_norm_b"] = _ln_params(D)
    params["gen_w"], params["gen_b"] = _dense(keys[4], D, tgt_vocab, n_pad=True)
    return params


# ----------------------------------------------------------------------------
if __name__ == "__main__":
    B = 2
    S = 8          # src seq len
    T = 8          # tgt seq len
    EMB = 32
    NHEAD = 4
    NUM_ENC = 2
    NUM_DEC = 2
    DIM_FF = 64
    SRC_VOCAB = 50
    TGT_VOCAB = 60

    root = jax.random.PRNGKey(0)
    kparam, ksrc, ktgt = jax.random.split(root, 3)

    params = make_params(kparam, NUM_ENC, NUM_DEC, EMB, DIM_FF, SRC_VOCAB, TGT_VOCAB)

    src = jax.random.randint(ksrc, (B, S), 0, SRC_VOCAB, dtype=jnp.int32)
    trg = jax.random.randint(ktgt, (B, T), 0, TGT_VOCAB, dtype=jnp.int32)

    # masks (PyTorch nn.Transformer conventions; kept for interface parity):
    src_mask = jnp.zeros((S, S), jnp.float32)                         # no src self-attn mask
    tgt_mask = jnp.triu(jnp.full((T, T), NEG_INF, jnp.float32), k=1)  # causal
    src_padding_mask = jnp.zeros((B, S), jnp.bool_)                   # True = pad/ignore
    tgt_padding_mask = jnp.zeros((B, T), jnp.bool_)
    memory_key_padding_mask = src_padding_mask

    fwd = jax.jit(functools.partial(seq2seq_transformer_forward,
                                    nhead=NHEAD, tgt_vocab=TGT_VOCAB))
    logits = fwd(params, src, trg, src_mask, tgt_mask,
                 src_padding_mask, tgt_padding_mask, memory_key_padding_mask)
    jax.block_until_ready(logits)

    assert logits.shape == (B, T, TGT_VOCAB), logits.shape
    assert logits.dtype == jnp.float32
    print("KERNEL_OK")
</pallas_src>

<mosaic_0001>
module attributes {stable_mosaic.version = 11 : i64} {
  func.func @_linear_kernel(%arg0: i32, %arg1: i32, %arg2: i32, %arg3: memref<16x32xf32, #tpu.memory_space<vmem>>, %arg4: memref<32x128xbf16, #tpu.memory_space<vmem>>, %arg5: memref<1x128xf32, #tpu.memory_space<vmem>>, %arg6: memref<16x128xbf16, #tpu.memory_space<vmem>>, %arg7: memref<16x128xf32, #tpu.memory_space<vmem>>) attributes {dimension_semantics = [#tpu.dimension_semantics<parallel>, #tpu.dimension_semantics<parallel>, #tpu.dimension_semantics<arbitrary>], iteration_bounds = array<i64: 1, 1, 1>, scalar_prefetch = 0 : i64, scratch_operands = 1 : i64, tpu.core_type = #tpu.core_type<tc>, window_params = [{transform_indices = @transform_0, window_bounds = array<i64: 16, 32>}, {transform_indices = @transform_1, window_bounds = array<i64: 32, 128>}, {transform_indices = @transform_2, window_bounds = array<i64: 1, 128>}, {transform_indices = @transform_3, window_bounds = array<i64: 16, 128>}]} {
    %c0_i32 = arith.constant 0 : i32
    %0 = arith.cmpi eq, %arg2, %c0_i32 : i32
    %1 = arith.extui %0 : i1 to i32
    %c0_i32_0 = arith.constant 0 : i32
    %2 = arith.cmpi ne, %1, %c0_i32_0 : i32
    scf.if %2 {
      %cst_10 = arith.constant 0.000000e+00 : f32
      %13 = vector.broadcast %cst_10 : f32 to vector<16x128xf32>
      %c0_11 = arith.constant 0 : index
      %c0_12 = arith.constant 0 : index
      %14 = vector.load %arg7[%c0_11, %c0_12] : memref<16x128xf32, #tpu.memory_space<vmem>>, vector<16x128xf32>
      tpu.vector_store %arg7[%c0_11, %c0_12], %13 {strides = array<i32>} : memref<16x128xf32, #tpu.memory_space<vmem>>, vector<16x128xf32>,
    } else {
    }
    %c0 = arith.constant 0 : index
    %c0_1 = arith.constant 0 : index
    %3 = vector.load %arg7[%c0, %c0_1] : memref<16x128xf32, #tpu.memory_space<vmem>>, vector<16x128xf32>
    %c0_2 = arith.constant 0 : index
    %c0_3 = arith.constant 0 : index
    %4 = vector.load %arg3[%c0_2, %c0_3] : memref<16x32xf32, #tpu.memory_space<vmem>>, vector<16x32xf32>
    %5 = arith.truncf %4 : vector<16x32xf32> to vector<16x32xbf16>
    %c0_4 = arith.constant 0 : index
    %c0_5 = arith.constant 0 : index
    %6 = vector.load %arg4[%c0_4, %c0_5] : memref<32x128xbf16, #tpu.memory_space<vmem>>, vector<32x128xbf16>
    %cst = arith.constant dense<0.000000e+00> : vector<16x128xf32>
    %7 = tpu.matmul %5, %6, %cst {dimension_numbers = #tpu.dot_dimension_numbers<[1], [0], [0], [1], [0, 0, 1, 1], [], []>} : vector<16x32xbf16>, vector<32x128xbf16>, vector<16x128xf32> -> vector<16x128xf32>
    %8 = arith.addf %3, %7 : vector<16x128xf32>
    %c0_6 = arith.constant 0 : index
    %c0_7 = arith.constant 0 : index
    %9 = vector.load %arg7[%c0_6, %c0_7] : memref<16x128xf32, #tpu.memory_space<vmem>>, vector<16x128xf32>
    tpu.vector_store %arg7[%c0_6, %c0_7], %8 {strides = array<i32>} : memref<16x128xf32, #tpu.memory_space<vmem>>, vector<16x128xf32>,
    %c0_i32_8 = arith.constant 0 : i32
    %10 = arith.cmpi eq, %arg2, %c0_i32_8 : i32
    %11 = arith.extui %10 : i1 to i32
    %c0_i32_9 = arith.constant 0 : i32
    %12 = arith.cmpi ne, %11, %c0_i32_9 : i32
    scf.if %12 {
      %c0_10 = arith.constant 0 : index
      %c0_11 = arith.constant 0 : index
      %13 = vector.load %arg7[%c0_10, %c0_11] : memref<16x128xf32, #tpu.memory_space<vmem>>, vector<16x128xf32>
      %c0_12 = arith.constant 0 : index
      %c0_13 = arith.constant 0 : index
      %14 = vector.load %arg5[%c0_12, %c0_13] : memref<1x128xf32, #tpu.memory_space<vmem>>, vector<1x128xf32>
      %15 = vector.broadcast %14 : vector<1x128xf32> to vector<16x128xf32>
      %16 = arith.addf %13, %15 : vector<16x128xf32>
      %17 = arith.truncf %16 : vector<16x128xf32> to vector<16x128xbf16>
      %c0_14 = arith.constant 0 : index
      %c0_15 = arith.constant 0 : index
      %18 = vector.load %arg6[%c0_14, %c0_15] : memref<16x128xbf16, #tpu.memory_space<vmem>>, vector<16x128xbf16>
      tpu.vector_store %arg6[%c0_14, %c0_15], %17 {strides = array<i32>} : memref<16x128xbf16, #tpu.memory_space<vmem>>, vector<16x128xbf16>,
    } else {
    }
    return
  }
  func.func @transform_0(%arg0: i32, %arg1: i32, %arg2: i32) -> (i32, i32) {
    %c0_i32 = arith.constant 0 : i32
    return %arg0, %arg2 : i32, i32
  }
  func.func @transform_1(%arg0: i32, %arg1: i32, %arg2: i32) -> (i32, i32) {
    %c0_i32 = arith.constant 0 : i32
    return %arg2, %arg1 : i32, i32
  }
  func.func @transform_2(%arg0: i32, %arg1: i32, %arg2: i32) -> (i32, i32) {
    %c0_i32 = arith.constant 0 : i32
    %c0_i32_0 = arith.constant 0 : i32
    return %c0_i32, %arg1 : i32, i32
  }
  func.func @transform_3(%arg0: i32, %arg1: i32, %arg2: i32) -> (i32, i32) {
    %c0_i32 = arith.constant 0 : i32
    return %arg0, %arg1 : i32, i32
  }
}

module attributes {stable_mosaic.version = 11 : i64} {
  func.func @_flash_attn_kernel(%arg0: i32, %arg1: i32, %arg2: i32, %arg3: i32, %arg4: memref<1x1x8x8xbf16, #tpu.memory_space<vmem>>, %arg5: memref<1x1x8x8xbf16, #tpu.memory_space<vmem>>, %arg6: memref<1x1x8x8xbf16, #tpu.memory_space<vmem>>, %arg7: memref<1x1x8xf32, #tpu.memory_space<vmem>>, %arg8: memref<1x1x8x8xbf16, #tpu.memory_space<vmem>>, %arg9: memref<8x1xf32, #tpu.memory_space<vmem>>, %arg10: memref<8x1xf32, #tpu.memory_space<vmem>>, %arg11: memref<8x8xf32, #tpu.memory_space<vmem>>) attributes {dimension_semantics = [#tpu.dimension_semantics<parallel>, #tpu.dimension_semantics<parallel>, #tpu.dimension_semantics<parallel>, #tpu.dimension_semantics<arbitrary>], iteration_bounds = array<i64: 2, 4, 1, 1>, scalar_prefetch = 0 : i64, scratch_operands = 3 : i64, tpu.core_type = #tpu.core_type<tc>, window_params = [{transform_indices = @transform_0, window_bounds = array<i64: 1, 1, 8, 8>}, {transform_indices = @transform_1, window_bounds = array<i64: 1, 1, 8, 8>}, {transform_indices = @transform_2, window_bounds = array<i64: 1, 1, 8, 8>}, {transform_indices = @transform_3, window_bounds = array<i64: 1, 1, 8>}, {transform_indices = @transform_4, window_bounds = array<i64: 1, 1, 8, 8>}]} {
    %c0_i32 = arith.constant 0 : i32
    %0 = arith.cmpi eq, %arg3, %c0_i32 : i32
    %1 = arith.extui %0 : i1 to i32
    %c0_i32_0 = arith.constant 0 : i32
    %2 = arith.cmpi ne, %1, %c0_i32_0 : i32
    scf.if %2 {
      %cst_35 = arith.constant 0xFF800000 : f32
      %55 = vector.broadcast %cst_35 : f32 to vector<8x1xf32>
      %c0_36 = arith.constant 0 : index
      %c0_37 = arith.constant 0 : index
      %56 = vector.load %arg9[%c0_36, %c0_37] : memref<8x1xf32, #tpu.memory_space<vmem>>, vector<8x1xf32>
      tpu.vector_store %arg9[%c0_36, %c0_37], %55 {strides = array<i32>} : memref<8x1xf32, #tpu.memory_space<vmem>>, vector<8x1xf32>,
      %cst_38 = arith.constant 0.000000e+00 : f32
      %57 = vector.broadcast %cst_38 : f32 to vector<8x1xf32>
      %c0_39 = arith.constant 0 : index
      %c0_40 = arith.constant 0 : index
      %58 = vector.load %arg10[%c0_39, %c0_40] : memref<8x1xf32, #tpu.memory_space<vmem>>, vector<8x1xf32>
      tpu.vector_store %arg10[%c0_39, %c0_40], %57 {strides = array<i32>} : memref<8x1xf32, #tpu.memory_space<vmem>>, vector<8x1xf32>,
      %cst_41 = arith.constant 0.000000e+00 : f32
      %59 = vector.broadcast %cst_41 : f32 to vector<8x8xf32>
      %c0_42 = arith.constant 0 : index
      %c0_43 = arith.constant 0 : index
      %60 = vector.load %arg11[%c0_42, %c0_43] : memref<8x8xf32, #tpu.memory_space<vmem>>, vector<8x8xf32>
      tpu.vector_store %arg11[%c0_42, %c0_43], %59 {strides = array<i32>} : memref<8x8xf32, #tpu.memory_space<vmem>>, vector<8x8xf32>,
    } else {
    }
    %c0 = arith.constant 0 : index
    %c0_1 = arith.constant 0 : index
    %c0_2 = arith.constant 0 : index
    %c0_3 = arith.constant 0 : index
    %3 = vector.load %arg4[%c0, %c0_1, %c0_2, %c0_3] : memref<1x1x8x8xbf16, #tpu.memory_space<vmem>>, vector<1x1x8x8xbf16>
    %4 = vector.shape_cast %3 : vector<1x1x8x8xbf16> to vector<8x8xbf16>
    %5 = arith.extf %4 : vector<8x8xbf16> to vector<8x8xf32>
    %cst = arith.constant 0.353553385 : f32
    %6 = vector.broadcast %cst : f32 to vector<8x8xf32>
    %7 = arith.mulf %5, %6 : vector<8x8xf32>
    %8 = arith.truncf %7 : vector<8x8xf32> to vector<8x8xbf16>
    %c0_4 = arith.constant 0 : index
    %c0_5 = arith.constant 0 : index
    %c0_6 = arith.constant 0 : index
    %c0_7 = arith.constant 0 : index
    %9 = vector.load %arg5[%c0_4, %c0_5, %c0_6, %c0_7] : memref<1x1x8x8xbf16, #tpu.memory_space<vmem>>, vector<1x1x8x8xbf16>
    %10 = vector.shape_cast %9 : vector<1x1x8x8xbf16> to vector<8x8xbf16>
    %cst_8 = arith.constant dense<0.000000e+00> : vector<8x8xf32>
    %11 = tpu.matmul %8, %10, %cst_8 {dimension_numbers = #tpu.dot_dimension_numbers<[1], [1], [0], [0], [0, 0, 1, 0], [], []>} : vector<8x8xbf16>, vector<8x8xbf16>, vector<8x8xf32> -> vector<8x8xf32>
    %c0_9 = arith.constant 0 : index
    %c0_10 = arith.constant 0 : index
    %c0_11 = arith.constant 0 : index
    %12 = vector.load %arg7[%c0_9, %c0_10, %c0_11] : memref<1x1x8xf32, #tpu.memory_space<vmem>>, vector<1x1x8xf32>
    %13 = vector.shape_cast %12 : vector<1x1x8xf32> to vector<1x8xf32>
    %14 = vector.broadcast %13 : vector<1x8xf32> to vector<8x8xf32>
    %15 = arith.addf %11, %14 : vector<8x8xf32>
    %c8_i32 = arith.constant 8 : i32
    %16 = arith.muli %arg2, %c8_i32 : i32
    %17 = tpu.iota {dimensions = array<i32: 0>} : vector<8x8xi32>
    %18 = vector.broadcast %16 : i32 to vector<8x8xi32>
    %19 = arith.addi %18, %17 : vector<8x8xi32>
    %c8_i32_12 = arith.constant 8 : i32
    %20 = arith.muli %arg3, %c8_i32_12 : i32
    %21 = tpu.iota {dimensions = array<i32: 1>} : vector<8x8xi32>
    %22 = vector.broadcast %20 : i32 to vector<8x8xi32>
    %23 = arith.addi %22, %21 : vector<8x8xi32>
    %24 = arith.cmpi sgt, %23, %19 : vector<8x8xi32>
    %cst_13 = arith.constant -1.000000e+30 : f32
    %25 = vector.broadcast %cst_13 : f32 to vector<8x8xf32>
    %26 = arith.select %24, %25, %15 : vector<8x8xi1>, vector<8x8xf32>
    %c0_14 = arith.constant 0 : index
    %c0_15 = arith.constant 0 : index
    %27 = vector.load %arg9[%c0_14, %c0_15] : memref<8x1xf32, #tpu.memory_space<vmem>>, vector<8x1xf32>
    %cst_16 = arith.constant dense<0xFF800000> : vector<8xf32>
    %28 = vector.multi_reduction <maximumf>, %26, %cst_16 [1] : vector<8x8xf32> to vector<8xf32>
    %29 = vector.shape_cast %28 : vector<8xf32> to vector<8x1xf32>
    %30 = arith.maximumf %27, %29 : vector<8x1xf32>
    %31 = arith.subf %27, %30 : vector<8x1xf32>
    %32 = math.exp %31 : vector<8x1xf32>
    %33 = vector.broadcast %30 : vector<8x1xf32> to vector<8x8xf32>
    %34 = arith.subf %26, %33 : vector<8x8xf32>
    %35 = math.exp %34 : vector<8x8xf32>
    %c0_17 = arith.constant 0 : index
    %c0_18 = arith.constant 0 : index
    %36 = vector.load %arg10[%c0_17, %c0_18] : memref<8x1xf32, #tpu.memory_space<vmem>>, vector<8x1xf32>
    %37 = arith.mulf %32, %36 : vector<8x1xf32>
    %cst_19 = arith.constant dense<0.000000e+00> : vector<8xf32>
    %38 = vector.multi_reduction <add>, %35, %cst_19 [1] : vector<8x8xf32> to vector<8xf32>
    %39 = vector.shape_cast %38 : vector<8xf32> to vector<8x1xf32>
    %40 = arith.addf %37, %39 : vector<8x1xf32>
    %c0_20 = arith.constant 0 : index
    %c0_21 = arith.constant 0 : index
    %41 = vector.load %arg10[%c0_20, %c0_21] : memref<8x1xf32, #tpu.memory_space<vmem>>, vector<8x1xf32>
    tpu.vector_store %arg10[%c0_20, %c0_21], %40 {strides = array<i32>} : memref<8x1xf32, #tpu.memory_space<vmem>>, vector<8x1xf32>,
    %c0_22 = arith.constant 0 : index
    %c0_23 = arith.constant 0 : index
    %42 = vector.load %arg11[%c0_22, %c0_23] : memref<8x8xf32, #tpu.memory_space<vmem>>, vector<8x8xf32>
    %43 = vector.broadcast %32 : vector<8x1xf32> to vector<8x8xf32>
    %44 = arith.mulf %43, %42 : vector<8x8xf32>
    %45 = arith.truncf %35 : vector<8x8xf32> to vector<8x8xbf16>
    %c0_24 = arith.constant 0 : index
    %c0_25 = arith.constant 0 : index
    %c0_26 = arith.constant 0 : index
    %c0_27 = arith.constant 0 : index
    %46 = vector.load %arg6[%c0_24, %c0_25, %c0_26, %c0_27] : memref<1x1x8x8xbf16, #tpu.memory_space<vmem>>, vector<1x1x8x8xbf16>
    %47 = vector.shape_cast %46 : vector<1x1x8x8xbf16> to vector<8x8xbf16>
    %cst_28 = arith.constant dense<0.000000e+00> : vector<8x8xf32>
    %48 = tpu.matmul %45, %47, %cst_28 {dimension_numbers = #tpu.dot_dimension_numbers<[1], [0], [0], [1], [0, 0, 1, 1], [], []>} : vector<8x8xbf16>, vector<8x8xbf16>, vector<8x8xf32> -> vector<8x8xf32>
    %49 = arith.addf %44, %48 : vector<8x8xf32>
    %c0_29 = arith.constant 0 : index
    %c0_30 = arith.constant 0 : index
    %50 = vector.load %arg11[%c0_29, %c0_30] : memref<8x8xf32, #tpu.memory_space<vmem>>, vector<8x8xf32>
    tpu.vector_store %arg11[%c0_29, %c0_30], %49 {strides = array<i32>} : memref<8x8xf32, #tpu.memory_space<vmem>>, vector<8x8xf32>,
    %c0_31 = arith.constant 0 : index
    %c0_32 = arith.constant 0 : index
    %51 = vector.load %arg9[%c0_31, %c0_32] : memref<8x1xf32, #tpu.memory_space<vmem>>, vector<8x1xf32>
    tpu.vector_store %arg9[%c0_31, %c0_32], %30 {strides = array<i32>} : memref<8x1xf32, #tpu.memory_space<vmem>>, vector<8x1xf32>,
    %c0_i32_33 = arith.constant 0 : i32
    %52 = arith.cmpi eq, %arg3, %c0_i32_33 : i32
    %53 = arith.extui %52 : i1 to i32
    %c0_i32_34 = arith.constant 0 : i32
    %54 = arith.cmpi ne, %53, %c0_i32_34 : i32
    scf.if %54 {
      %c0_35 = arith.constant 0 : index
      %c0_36 = arith.constant 0 : index
      %55 = vector.load %arg11[%c0_35, %c0_36] : memref<8x8xf32, #tpu.memory_space<vmem>>, vector<8x8xf32>
      %c0_37 = arith.constant 0 : index
      %c0_38 = arith.constant 0 : index
      %56 = vector.load %arg10[%c0_37, %c0_38] : memref<8x1xf32, #tpu.memory_space<vmem>>, vector<8x1xf32>
      %57 = tpu.reciprocal %56 {approx = true} : vector<8x1xf32> -> vector<8x1xf32>
      %58 = vector.broadcast %57 : vector<8x1xf32> to vector<8x8xf32>
      %59 = arith.mulf %55, %58 : vector<8x8xf32>
      %60 = arith.truncf %59 : vector<8x8xf32> to vector<8x8xbf16>
      %c0_39 = arith.constant 0 : index
      %c0_40 = arith.constant 0 : index
      %c0_41 = arith.constant 0 : index
      %c0_42 = arith.constant 0 : index
      %61 = vector.load %arg8[%c0_39, %c0_40, %c0_41, %c0_42] : memref<1x1x8x8xbf16, #tpu.memory_space<vmem>>, vector<1x1x8x8xbf16>
      %62 = vector.shape_cast %61 : vector<1x1x8x8xbf16> to vector<8x8xbf16>
      %63 = vector.shape_cast %60 : vector<8x8xbf16> to vector<1x1x8x8xbf16>
      tpu.vector_store %arg8[%c0_39, %c0_40, %c0_41, %c0_42], %63 {strides = array<i32>} : memref<1x1x8x8xbf16, #tpu.memory_space<vmem>>, vector<1x1x8x8xbf16>,
    } else {
    }
    return
  }
  func.func @transform_0(%arg0: i32, %arg1: i32, %arg2: i32, %arg3: i32) -> (i32, i32, i32, i32) {
    %c0_i32 = arith.constant 0 : i32
    %c0_i32_0 = arith.constant 0 : i32
    return %arg0, %arg1, %arg2, %c0_i32 : i32, i32, i32, i32
  }
  func.func @transform_1(%arg0: i32, %arg1: i32, %arg2: i32, %arg3: i32) -> (i32, i32, i32, i32) {
    %c0_i32 = arith.constant 0 : i32
    %c0_i32_0 = arith.constant 0 : i32
    return %arg0, %arg1, %arg3, %c0_i32 : i32, i32, i32, i32
  }
  func.func @transform_2(%arg0: i32, %arg1: i32, %arg2: i32, %arg3: i32) -> (i32, i32, i32, i32) {
    %c0_i32 = arith.constant 0 : i32
    %c0_i32_0 = arith.constant 0 : i32
    return %arg0, %arg1, %arg3, %c0_i32 : i32, i32, i32, i32
  }
  func.func @transform_3(%arg0: i32, %arg1: i32, %arg2: i32, %arg3: i32) -> (i32, i32, i32) {
    %c0_i32 = arith.constant 0 : i32
    %c0_i32_0 = arith.constant 0 : i32
    return %arg0, %c0_i32, %arg3 : i32, i32, i32
  }
  func.func @transform_4(%arg0: i32, %arg1: i32, %arg2: i32, %arg3: i32) -> (i32, i32, i32, i32) {
    %c0_i32 = arith.constant 0 : i32
    %c0_i32_0 = arith.constant 0 : i32
    return %arg0, %arg1, %arg2, %c0_i32 : i32, i32, i32, i32
  }
}

module attributes {stable_mosaic.version = 11 : i64} {
  func.func @_linear_add_ln_kernel(%arg0: i32, %arg1: i32, %arg2: memref<16x32xbf16, #tpu.memory_space<vmem>>, %arg3: memref<32x32xbf16, #tpu.memory_space<vmem>>, %arg4: memref<1x32xf32, #tpu.memory_space<vmem>>, %arg5: memref<16x32xf32, #tpu.memory_space<vmem>>, %arg6: memref<1x32xf32, #tpu.memory_space<vmem>>, %arg7: memref<1x32xf32, #tpu.memory_space<vmem>>, %arg8: memref<16x32xf32, #tpu.memory_space<vmem>>, %arg9: memref<16x32xf32, #tpu.memory_space<vmem>>) attributes {dimension_semantics = [#tpu.dimension_semantics<parallel>, #tpu.dimension_semantics<arbitrary>], iteration_bounds = array<i64: 1, 1>, scalar_prefetch = 0 : i64, scratch_operands = 1 : i64, tpu.core_type = #tpu.core_type<tc>, window_params = [{transform_indices = @transform_0, window_bounds = array<i64: 16, 32>}, {transform_indices = @transform_1, window_bounds = array<i64: 32, 32>}, {pipeline_mode = #tpu.pipeline_mode<synchronous>, transform_indices = @transform_2, window_bounds = array<i64: 1, 32>}, {transform_indices = @transform_3, window_bounds = array<i64: 16, 32>}, {pipeline_mode = #tpu.pipeline_mode<synchronous>, transform_indices = @transform_4, window_bounds = array<i64: 1, 32>}, {pipeline_mode = #tpu.pipeline_mode<synchronous>, transform_indices = @transform_5, window_bounds = array<i64: 1, 32>}, {transform_indices = @transform_6, window_bounds = array<i64: 16, 32>}]} {
    %c0_i32 = arith.constant 0 : i32
    %0 = arith.cmpi eq, %arg1, %c0_i32 : i32
    %1 = arith.extui %0 : i1 to i32
    %c0_i32_0 = arith.constant 0 : i32
    %2 = arith.cmpi ne, %1, %c0_i32_0 : i32
    scf.if %2 {
      %cst_10 = arith.constant 0.000000e+00 : f32
      %12 = vector.broadcast %cst_10 : f32 to vector<16x32xf32>
      %c0_11 = arith.constant 0 : index
      %c0_12 = arith.constant 0 : index
      %13 = vector.load %arg9[%c0_11, %c0_12] : memref<16x32xf32, #tpu.memory_space<vmem>>, vector<16x32xf32>
      tpu.vector_store %arg9[%c0_11, %c0_12], %12 {strides = array<i32>} : memref<16x32xf32, #tpu.memory_space<vmem>>, vector<16x32xf32>,
    } else {
    }
    %c0 = arith.constant 0 : index
    %c0_1 = arith.constant 0 : index
    %3 = vector.load %arg9[%c0, %c0_1] : memref<16x32xf32, #tpu.memory_space<vmem>>, vector<16x32xf32>
    %c0_2 = arith.constant 0 : index
    %c0_3 = arith.constant 0 : index
    %4 = vector.load %arg2[%c0_2, %c0_3] : memref<16x32xbf16, #tpu.memory_space<vmem>>, vector<16x32xbf16>
    %c0_4 = arith.constant 0 : index
    %c0_5 = arith.constant 0 : index
    %5 = vector.load %arg3[%c0_4, %c0_5] : memref<32x32xbf16, #tpu.memory_space<vmem>>, vector<32x32xbf16>
    %cst = arith.constant dense<0.000000e+00> : vector<16x32xf32>
    %6 = tpu.matmul %4, %5, %cst {dimension_numbers = #tpu.dot_dimension_numbers<[1], [0], [0], [1], [0, 0, 1, 1], [], []>} : vector<16x32xbf16>, vector<32x32xbf16>, vector<16x32xf32> -> vector<16x32xf32>
    %7 = arith.addf %3, %6 : vector<16x32xf32>
    %c0_6 = arith.constant 0 : index
    %c0_7 = arith.constant 0 : index
    %8 = vector.load %arg9[%c0_6, %c0_7] : memref<16x32xf32, #tpu.memory_space<vmem>>, vector<16x32xf32>
    tpu.vector_store %arg9[%c0_6, %c0_7], %7 {strides = array<i32>} : memref<16x32xf32, #tpu.memory_space<vmem>>, vector<16x32xf32>,
    %c0_i32_8 = arith.constant 0 : i32
    %9 = arith.cmpi eq, %arg1, %c0_i32_8 : i32
    %10 = arith.extui %9 : i1 to i32
    %c0_i32_9 = arith.constant 0 : i32
    %11 = arith.cmpi ne, %10, %c0_i32_9 : i32
    scf.if %11 {
      %c0_10 = arith.constant 0 : index
      %c0_11 = arith.constant 0 : index
      %12 = vector.load %arg9[%c0_10, %c0_11] : memref<16x32xf32, #tpu.memory_space<vmem>>, vector<16x32xf32>
      %c0_12 = arith.constant 0 : index
      %c0_13 = arith.constant 0 : index
      %13 = vector.load %arg4[%c0_12, %c0_13] : memref<1x32xf32, #tpu.memory_space<vmem>>, vector<1x32xf32>
      %14 = vector.broadcast %13 : vector<1x32xf32> to vector<16x32xf32>
      %15 = arith.addf %12, %14 : vector<16x32xf32>
      %c0_14 = arith.constant 0 : index
      %c0_15 = arith.constant 0 : index
      %16 = vector.load %arg5[%c0_14, %c0_15] : memref<16x32xf32, #tpu.memory_space<vmem>>, vector<16x32xf32>
      %17 = arith.addf %15, %16 : vector<16x32xf32>
      %cst_16 = arith.constant dense<0.000000e+00> : vector<16xf32>
      %18 = vector.multi_reduction <add>, %17, %cst_16 [1] : vector<16x32xf32> to vector<16xf32>
      %19 = vector.shape_cast %18 : vector<16xf32> to vector<16x1xf32>
      %cst_17 = arith.constant 3.200000e+01 : f32
      %20 = vector.broadcast %cst_17 : f32 to vector<16x1xf32>
      %21 = arith.divf %19, %20 : vector<16x1xf32>
      %22 = vector.broadcast %21 : vector<16x1xf32> to vector<16x32xf32>
      %23 = arith.subf %17, %22 : vector<16x32xf32>
      %24 = arith.mulf %23, %23 : vector<16x32xf32>
      %cst_18 = arith.constant dense<0.000000e+00> : vector<16xf32>
      %25 = vector.multi_reduction <add>, %24, %cst_18 [1] : vector<16x32xf32> to vector<16xf32>
      %26 = vector.shape_cast %25 : vector<16xf32> to vector<16x1xf32>
      %cst_19 = arith.constant 3.200000e+01 : f32
      %27 = vector.broadcast %cst_19 : f32 to vector<16x1xf32>
      %28 = arith.divf %26, %27 : vector<16x1xf32>
      %29 = vector.broadcast %21 : vector<16x1xf32> to vector<16x32xf32>
      %30 = arith.subf %17, %29 : vector<16x32xf32>
      %cst_20 = arith.constant 9.99999974E-6 : f32
      %31 = vector.broadcast %cst_20 : f32 to vector<16x1xf32>
      %32 = arith.addf %28, %31 : vector<16x1xf32>
      %33 = math.rsqrt %32 : vector<16x1xf32>
      %34 = vector.broadcast %33 : vector<16x1xf32> to vector<16x32xf32>
      %35 = arith.mulf %30, %34 : vector<16x32xf32>
      %c0_21 = arith.constant 0 : index
      %c0_22 = arith.constant 0 : index
      %36 = vector.load %arg6[%c0_21, %c0_22] : memref<1x32xf32, #tpu.memory_space<vmem>>, vector<1x32xf32>
      %37 = vector.broadcast %36 : vector<1x32xf32> to vector<16x32xf32>
      %38 = arith.mulf %35, %37 : vector<16x32xf32>
      %c0_23 = arith.constant 0 : index
      %c0_24 = arith.constant 0 : index
      %39 = vector.load %arg7[%c0_23, %c0_24] : memref<1x32xf32, #tpu.memory_space<vmem>>, vector<1x32xf32>
      %40 = vector.broadcast %39 : vector<1x32xf32> to vector<16x32xf32>
      %41 = arith.addf %38, %40 : vector<16x32xf32>
      %c0_25 = arith.constant 0 : index
      %c0_26 = arith.constant 0 : index
      %42 = vector.load %arg8[%c0_25, %c0_26] : memref<16x32xf32, #tpu.memory_space<vmem>>, vector<16x32xf32>
      tpu.vector_store %arg8[%c0_25, %c0_26], %41 {strides = array<i32>} : memref<16x32xf32, #tpu.memory_space<vmem>>, vector<16x32xf32>,
    } else {
    }
    return
  }
  func.func @transform_0(%arg0: i32, %arg1: i32) -> (i32, i32) {
    %c0_i32 = arith.constant 0 : i32
    return %arg0, %arg1 : i32, i32
  }
  func.func @transform_1(%arg0: i32, %arg1: i32) -> (i32, i32) {
    %c0_i32 = arith.constant 0 : i32
    %c0_i32_0 = arith.constant 0 : i32
    return %arg1, %c0_i32 : i32, i32
  }
  func.func @transform_2(%arg0: i32, %arg1: i32) -> (i32, i32) {
    %c0_i32 = arith.constant 0 : i32
    %c0_i32_0 = arith.constant 0 : i32
    %c0_i32_1 = arith.constant 0 : i32
    return %c0_i32, %c0_i32_0 : i32, i32
  }
  func.func @transform_3(%arg0: i32, %arg1: i32) -> (i32, i32) {
    %c0_i32 = arith.constant 0 : i32
    %c0_i32_0 = arith.constant 0 : i32
    return %arg0, %c0_i32 : i32, i32
  }
  func.func @transform_4(%arg0: i32, %arg1: i32) -> (i32, i32) {
    %c0_i32 = arith.constant 0 : i32
    %c0_i32_0 = arith.constant 0 : i32
    %c0_i32_1 = arith.constant 0 : i32
    return %c0_i32, %c0_i32_0 : i32, i32
  }
  func.func @transform_5(%arg0: i32, %arg1: i32) -> (i32, i32) {
    %c0_i32 = arith.constant 0 : i32
    %c0_i32_0 = arith.constant 0 : i32
    %c0_i32_1 = arith.constant 0 : i32
    return %c0_i32, %c0_i32_0 : i32, i32
  }
  func.func @transform_6(%arg0: i32, %arg1: i32) -> (i32, i32) {
    %c0_i32 = arith.constant 0 : i32
    %c0_i32_0 = arith.constant 0 : i32
    return %arg0, %c0_i32 : i32, i32
  }
}

module attributes {stable_mosaic.version = 11 : i64} {
  func.func @_flash_attn_kernel(%arg0: i32, %arg1: i32, %arg2: i32, %arg3: i32, %arg4: memref<1x1x8x8xbf16, #tpu.memory_space<vmem>>, %arg5: memref<1x1x8x8xbf16, #tpu.memory_space<vmem>>, %arg6: memref<1x1x8x8xbf16, #tpu.memory_space<vmem>>, %arg7: memref<1x1x8xf32, #tpu.memory_space<vmem>>, %arg8: memref<1x1x8x8xbf16, #tpu.memory_space<vmem>>, %arg9: memref<8x1xf32, #tpu.memory_space<vmem>>, %arg10: memref<8x1xf32, #tpu.memory_space<vmem>>, %arg11: memref<8x8xf32, #tpu.memory_space<vmem>>) attributes {dimension_semantics = [#tpu.dimension_semantics<parallel>, #tpu.dimension_semantics<parallel>, #tpu.dimension_semantics<parallel>, #tpu.dimension_semantics<arbitrary>], iteration_bounds = array<i64: 2, 4, 1, 1>, scalar_prefetch = 0 : i64, scratch_operands = 3 : i64, tpu.core_type = #tpu.core_type<tc>, window_params = [{transform_indices = @transform_0, window_bounds = array<i64: 1, 1, 8, 8>}, {transform_indices = @transform_1, window_bounds = array<i64: 1, 1, 8, 8>}, {transform_indices = @transform_2, window_bounds = array<i64: 1, 1, 8, 8>}, {transform_indices = @transform_3, window_bounds = array<i64: 1, 1, 8>}, {transform_indices = @transform_4, window_bounds = array<i64: 1, 1, 8, 8>}]} {
    %c0_i32 = arith.constant 0 : i32
    %0 = arith.cmpi eq, %arg3, %c0_i32 : i32
    %1 = arith.extui %0 : i1 to i32
    %c0_i32_0 = arith.constant 0 : i32
    %2 = arith.cmpi ne, %1, %c0_i32_0 : i32
    scf.if %2 {
      %cst_33 = arith.constant 0xFF800000 : f32
      %44 = vector.broadcast %cst_33 : f32 to vector<8x1xf32>
      %c0_34 = arith.constant 0 : index
      %c0_35 = arith.constant 0 : index
      %45 = vector.load %arg9[%c0_34, %c0_35] : memref<8x1xf32, #tpu.memory_space<vmem>>, vector<8x1xf32>
      tpu.vector_store %arg9[%c0_34, %c0_35], %44 {strides = array<i32>} : memref<8x1xf32, #tpu.memory_space<vmem>>, vector<8x1xf32>,
      %cst_36 = arith.constant 0.000000e+00 : f32
      %46 = vector.broadcast %cst_36 : f32 to vector<8x1xf32>
      %c0_37 = arith.constant 0 : index
      %c0_38 = arith.constant 0 : index
      %47 = vector.load %arg10[%c0_37, %c0_38] : memref<8x1xf32, #tpu.memory_space<vmem>>, vector<8x1xf32>
      tpu.vector_store %arg10[%c0_37, %c0_38], %46 {strides = array<i32>} : memref<8x1xf32, #tpu.memory_space<vmem>>, vector<8x1xf32>,
      %cst_39 = arith.constant 0.000000e+00 : f32
      %48 = vector.broadcast %cst_39 : f32 to vector<8x8xf32>
      %c0_40 = arith.constant 0 : index
      %c0_41 = arith.constant 0 : index
      %49 = vector.load %arg11[%c0_40, %c0_41] : memref<8x8xf32, #tpu.memory_space<vmem>>, vector<8x8xf32>
      tpu.vector_store %arg11[%c0_40, %c0_41], %48 {strides = array<i32>} : memref<8x8xf32, #tpu.memory_space<vmem>>, vector<8x8xf32>,
    } else {
    }
    %c0 = arith.constant 0 : index
    %c0_1 = arith.constant 0 : index
    %c0_2 = arith.constant 0 : index
    %c0_3 = arith.constant 0 : index
    %3 = vector.load %arg4[%c0, %c0_1, %c0_2, %c0_3] : memref<1x1x8x8xbf16, #tpu.memory_space<vmem>>, vector<1x1x8x8xbf16>
    %4 = vector.shape_cast %3 : vector<1x1x8x8xbf16> to vector<8x8xbf16>
    %5 = arith.extf %4 : vector<8x8xbf16> to vector<8x8xf32>
    %cst = arith.constant 0.353553385 : f32
    %6 = vector.broadcast %cst : f32 to vector<8x8xf32>
    %7 = arith.mulf %5, %6 : vector<8x8xf32>
    %8 = arith.truncf %7 : vector<8x8xf32> to vector<8x8xbf16>
    %c0_4 = arith.constant 0 : index
    %c0_5 = arith.constant 0 : index
    %c0_6 = arith.constant 0 : index
    %c0_7 = arith.constant 0 : index
    %9 = vector.load %arg5[%c0_4, %c0_5, %c0_6, %c0_7] : memref<1x1x8x8xbf16, #tpu.memory_space<vmem>>, vector<1x1x8x8xbf16>
    %10 = vector.shape_cast %9 : vector<1x1x8x8xbf16> to vector<8x8xbf16>
    %cst_8 = arith.constant dense<0.000000e+00> : vector<8x8xf32>
    %11 = tpu.matmul %8, %10, %cst_8 {dimension_numbers = #tpu.dot_dimension_numbers<[1], [1], [0], [0], [0, 0, 1, 0], [], []>} : vector<8x8xbf16>, vector<8x8xbf16>, vector<8x8xf32> -> vector<8x8xf32>
    %c0_9 = arith.constant 0 : index
    %c0_10 = arith.constant 0 : index
    %c0_11 = arith.constant 0 : index
    %12 = vector.load %arg7[%c0_9, %c0_10, %c0_11] : memref<1x1x8xf32, #tpu.memory_space<vmem>>, vector<1x1x8xf32>
    %13 = vector.shape_cast %12 : vector<1x1x8xf32> to vector<1x8xf32>
    %14 = vector.broadcast %13 : vector<1x8xf32> to vector<8x8xf32>
    %15 = arith.addf %11, %14 : vector<8x8xf32>
    %c0_12 = arith.constant 0 : index
    %c0_13 = arith.constant 0 : index
    %16 = vector.load %arg9[%c0_12, %c0_13] : memref<8x1xf32, #tpu.memory_space<vmem>>, vector<8x1xf32>
    %cst_14 = arith.constant dense<0xFF800000> : vector<8xf32>
    %17 = vector.multi_reduction <maximumf>, %15, %cst_14 [1] : vector<8x8xf32> to vector<8xf32>
    %18 = vector.shape_cast %17 : vector<8xf32> to vector<8x1xf32>
    %19 = arith.maximumf %16, %18 : vector<8x1xf32>
    %20 = arith.subf %16, %19 : vector<8x1xf32>
    %21 = math.exp %20 : vector<8x1xf32>
    %22 = vector.broadcast %19 : vector<8x1xf32> to vector<8x8xf32>
    %23 = arith.subf %15, %22 : vector<8x8xf32>
    %24 = math.exp %23 : vector<8x8xf32>
    %c0_15 = arith.constant 0 : index
    %c0_16 = arith.constant 0 : index
    %25 = vector.load %arg10[%c0_15, %c0_16] : memref<8x1xf32, #tpu.memory_space<vmem>>, vector<8x1xf32>
    %26 = arith.mulf %21, %25 : vector<8x1xf32>
    %cst_17 = arith.constant dense<0.000000e+00> : vector<8xf32>
    %27 = vector.multi_reduction <add>, %24, %cst_17 [1] : vector<8x8xf32> to vector<8xf32>
    %28 = vector.shape_cast %27 : vector<8xf32> to vector<8x1xf32>
    %29 = arith.addf %26, %28 : vector<8x1xf32>
    %c0_18 = arith.constant 0 : index
    %c0_19 = arith.constant 0 : index
    %30 = vector.load %arg10[%c0_18, %c0_19] : memref<8x1xf32, #tpu.memory_space<vmem>>, vector<8x1xf32>
    tpu.vector_store %arg10[%c0_18, %c0_19], %29 {strides = array<i32>} : memref<8x1xf32, #tpu.memory_space<vmem>>, vector<8x1xf32>,
    %c0_20 = arith.constant 0 : index
    %c0_21 = arith.constant 0 : index
    %31 = vector.load %arg11[%c0_20, %c0_21] : memref<8x8xf32, #tpu.memory_space<vmem>>, vector<8x8xf32>
    %32 = vector.broadcast %21 : vector<8x1xf32> to vector<8x8xf32>
    %33 = arith.mulf %32, %31 : vector<8x8xf32>
    %34 = arith.truncf %24 : vector<8x8xf32> to vector<8x8xbf16>
    %c0_22 = arith.constant 0 : index
    %c0_23 = arith.constant 0 : index
    %c0_24 = arith.constant 0 : index
    %c0_25 = arith.constant 0 : index
    %35 = vector.load %arg6[%c0_22, %c0_23, %c0_24, %c0_25] : memref<1x1x8x8xbf16, #tpu.memory_space<vmem>>, vector<1x1x8x8xbf16>
    %36 = vector.shape_cast %35 : vector<1x1x8x8xbf16> to vector<8x8xbf16>
    %cst_26 = arith.constant dense<0.000000e+00> : vector<8x8xf32>
    %37 = tpu.matmul %34, %36, %cst_26 {dimension_numbers = #tpu.dot_dimension_numbers<[1], [0], [0], [1], [0, 0, 1, 1], [], []>} : vector<8x8xbf16>, vector<8x8xbf16>, vector<8x8xf32> -> vector<8x8xf32>
    %38 = arith.addf %33, %37 : vector<8x8xf32>
    %c0_27 = arith.constant 0 : index
    %c0_28 = arith.constant 0 : index
    %39 = vector.load %arg11[%c0_27, %c0_28] : memref<8x8xf32, #tpu.memory_space<vmem>>, vector<8x8xf32>
    tpu.vector_store %arg11[%c0_27, %c0_28], %38 {strides = array<i32>} : memref<8x8xf32, #tpu.memory_space<vmem>>, vector<8x8xf32>,
    %c0_29 = arith.constant 0 : index
    %c0_30 = arith.constant 0 : index
    %40 = vector.load %arg9[%c0_29, %c0_30] : memref<8x1xf32, #tpu.memory_space<vmem>>, vector<8x1xf32>
    tpu.vector_store %arg9[%c0_29, %c0_30], %19 {strides = array<i32>} : memref<8x1xf32, #tpu.memory_space<vmem>>, vector<8x1xf32>,
    %c0_i32_31 = arith.constant 0 : i32
    %41 = arith.cmpi eq, %arg3, %c0_i32_31 : i32
    %42 = arith.extui %41 : i1 to i32
    %c0_i32_32 = arith.constant 0 : i32
    %43 = arith.cmpi ne, %42, %c0_i32_32 : i32
    scf.if %43 {
      %c0_33 = arith.constant 0 : index
      %c0_34 = arith.constant 0 : index
      %44 = vector.load %arg11[%c0_33, %c0_34] : memref<8x8xf32, #tpu.memory_space<vmem>>, vector<8x8xf32>
      %c0_35 = arith.constant 0 : index
      %c0_36 = arith.constant 0 : index
      %45 = vector.load %arg10[%c0_35, %c0_36] : memref<8x1xf32, #tpu.memory_space<vmem>>, vector<8x1xf32>
      %46 = tpu.reciprocal %45 {approx = true} : vector<8x1xf32> -> vector<8x1xf32>
      %47 = vector.broadcast %46 : vector<8x1xf32> to vector<8x8xf32>
      %48 = arith.mulf %44, %47 : vector<8x8xf32>
      %49 = arith.truncf %48 : vector<8x8xf32> to vector<8x8xbf16>
      %c0_37 = arith.constant 0 : index
      %c0_38 = arith.constant 0 : index
      %c0_39 = arith.constant 0 : index
      %c0_40 = arith.constant 0 : index
      %50 = vector.load %arg8[%c0_37, %c0_38, %c0_39, %c0_40] : memref<1x1x8x8xbf16, #tpu.memory_space<vmem>>, vector<1x1x8x8xbf16>
      %51 = vector.shape_cast %50 : vector<1x1x8x8xbf16> to vector<8x8xbf16>
      %52 = vector.shape_cast %49 : vector<8x8xbf16> to vector<1x1x8x8xbf16>
      tpu.vector_store %arg8[%c0_37, %c0_38, %c0_39, %c0_40], %52 {strides = array<i32>} : memref<1x1x8x8xbf16, #tpu.memory_space<vmem>>, vector<1x1x8x8xbf16>,
    } else {
    }
    return
  }
  func.func @transform_0(%arg0: i32, %arg1: i32, %arg2: i32, %arg3: i32) -> (i32, i32, i32, i32) {
    %c0_i32 = arith.constant 0 : i32
    %c0_i32_0 = arith.constant 0 : i32
    return %arg0, %arg1, %arg2, %c0_i32 : i32, i32, i32, i32
  }
  func.func @transform_1(%arg0: i32, %arg1: i32, %arg2: i32, %arg3: i32) -> (i32, i32, i32, i32) {
    %c0_i32 = arith.constant 0 : i32
    %c0_i32_0 = arith.constant 0 : i32
    return %arg0, %arg1, %arg3, %c0_i32 : i32, i32, i32, i32
  }
  func.func @transform_2(%arg0: i32, %arg1: i32, %arg2: i32, %arg3: i32) -> (i32, i32, i32, i32) {
    %c0_i32 = arith.constant 0 : i32
    %c0_i32_0 = arith.constant 0 : i32
    return %arg0, %arg1, %arg3, %c0_i32 : i32, i32, i32, i32
  }
  func.func @transform_3(%arg0: i32, %arg1: i32, %arg2: i32, %arg3: i32) -> (i32, i32, i32) {
    %c0_i32 = arith.constant 0 : i32
    %c0_i32_0 = arith.constant 0 : i32
    return %arg0, %c0_i32, %arg3 : i32, i32, i32
  }
  func.func @transform_4(%arg0: i32, %arg1: i32, %arg2: i32, %arg3: i32) -> (i32, i32, i32, i32) {
    %c0_i32 = arith.constant 0 : i32
    %c0_i32_0 = arith.constant 0 : i32
    return %arg0, %arg1, %arg2, %c0_i32 : i32, i32, i32, i32
  }
}

module attributes {stable_mosaic.version = 11 : i64} {
  func.func @_linear_kernel(%arg0: i32, %arg1: i32, %arg2: i32, %arg3: memref<16x32xf32, #tpu.memory_space<vmem>>, %arg4: memref<32x128xbf16, #tpu.memory_space<vmem>>, %arg5: memref<1x128xf32, #tpu.memory_space<vmem>>, %arg6: memref<16x128xbf16, #tpu.memory_space<vmem>>, %arg7: memref<16x128xf32, #tpu.memory_space<vmem>>) attributes {dimension_semantics = [#tpu.dimension_semantics<parallel>, #tpu.dimension_semantics<parallel>, #tpu.dimension_semantics<arbitrary>], iteration_bounds = array<i64: 1, 1, 1>, scalar_prefetch = 0 : i64, scratch_operands = 1 : i64, tpu.core_type = #tpu.core_type<tc>, window_params = [{transform_indices = @transform_0, window_bounds = array<i64: 16, 32>}, {transform_indices = @transform_1, window_bounds = array<i64: 32, 128>}, {transform_indices = @transform_2, window_bounds = array<i64: 1, 128>}, {transform_indices = @transform_3, window_bounds = array<i64: 16, 128>}]} {
    %c0_i32 = arith.constant 0 : i32
    %0 = arith.cmpi eq, %arg2, %c0_i32 : i32
    %1 = arith.extui %0 : i1 to i32
    %c0_i32_0 = arith.constant 0 : i32
    %2 = arith.cmpi ne, %1, %c0_i32_0 : i32
    scf.if %2 {
      %cst_10 = arith.constant 0.000000e+00 : f32
      %13 = vector.broadcast %cst_10 : f32 to vector<16x128xf32>
      %c0_11 = arith.constant 0 : index
      %c0_12 = arith.constant 0 : index
      %14 = vector.load %arg7[%c0_11, %c0_12] : memref<16x128xf32, #tpu.memory_space<vmem>>, vector<16x128xf32>
      tpu.vector_store %arg7[%c0_11, %c0_12], %13 {strides = array<i32>} : memref<16x128xf32, #tpu.memory_space<vmem>>, vector<16x128xf32>,
    } else {
    }
    %c0 = arith.constant 0 : index
    %c0_1 = arith.constant 0 : index
    %3 = vector.load %arg7[%c0, %c0_1] : memref<16x128xf32, #tpu.memory_space<vmem>>, vector<16x128xf32>
    %c0_2 = arith.constant 0 : index
    %c0_3 = arith.constant 0 : index
    %4 = vector.load %arg3[%c0_2, %c0_3] : memref<16x32xf32, #tpu.memory_space<vmem>>, vector<16x32xf32>
    %5 = arith.truncf %4 : vector<16x32xf32> to vector<16x32xbf16>
    %c0_4 = arith.constant 0 : index
    %c0_5 = arith.constant 0 : index
    %6 = vector.load %arg4[%c0_4, %c0_5] : memref<32x128xbf16, #tpu.memory_space<vmem>>, vector<32x128xbf16>
    %cst = arith.constant dense<0.000000e+00> : vector<16x128xf32>
    %7 = tpu.matmul %5, %6, %cst {dimension_numbers = #tpu.dot_dimension_numbers<[1], [0], [0], [1], [0, 0, 1, 1], [], []>} : vector<16x32xbf16>, vector<32x128xbf16>, vector<16x128xf32> -> vector<16x128xf32>
    %8 = arith.addf %3, %7 : vector<16x128xf32>
    %c0_6 = arith.constant 0 : index
    %c0_7 = arith.constant 0 : index
    %9 = vector.load %arg7[%c0_6, %c0_7] : memref<16x128xf32, #tpu.memory_space<vmem>>, vector<16x128xf32>
    tpu.vector_store %arg7[%c0_6, %c0_7], %8 {strides = array<i32>} : memref<16x128xf32, #tpu.memory_space<vmem>>, vector<16x128xf32>,
    %c0_i32_8 = arith.constant 0 : i32
    %10 = arith.cmpi eq, %arg2, %c0_i32_8 : i32
    %11 = arith.extui %10 : i1 to i32
    %c0_i32_9 = arith.constant 0 : i32
    %12 = arith.cmpi ne, %11, %c0_i32_9 : i32
    scf.if %12 {
      %c0_10 = arith.constant 0 : index
      %c0_11 = arith.constant 0 : index
      %13 = vector.load %arg7[%c0_10, %c0_11] : memref<16x128xf32, #tpu.memory_space<vmem>>, vector<16x128xf32>
      %c0_12 = arith.constant 0 : index
      %c0_13 = arith.constant 0 : index
      %14 = vector.load %arg5[%c0_12, %c0_13] : memref<1x128xf32, #tpu.memory_space<vmem>>, vector<1x128xf32>
      %15 = vector.broadcast %14 : vector<1x128xf32> to vector<16x128xf32>
      %16 = arith.addf %13, %15 : vector<16x128xf32>
      %cst_14 = arith.constant 0.000000e+00 : f32
      %17 = vector.broadcast %cst_14 : f32 to vector<16x128xf32>
      %18 = arith.maximumf %16, %17 : vector<16x128xf32>
      %19 = arith.truncf %18 : vector<16x128xf32> to vector<16x128xbf16>
      %c0_15 = arith.constant 0 : index
      %c0_16 = arith.constant 0 : index
      %20 = vector.load %arg6[%c0_15, %c0_16] : memref<16x128xbf16, #tpu.memory_space<vmem>>, vector<16x128xbf16>
      tpu.vector_store %arg6[%c0_15, %c0_16], %19 {strides = array<i32>} : memref<16x128xbf16, #tpu.memory_space<vmem>>, vector<16x128xbf16>,
    } else {
    }
    return
  }
  func.func @transform_0(%arg0: i32, %arg1: i32, %arg2: i32) -> (i32, i32) {
    %c0_i32 = arith.constant 0 : i32
    return %arg0, %arg2 : i32, i32
  }
  func.func @transform_1(%arg0: i32, %arg1: i32, %arg2: i32) -> (i32, i32) {
    %c0_i32 = arith.constant 0 : i32
    return %arg2, %arg1 : i32, i32
  }
  func.func @transform_2(%arg0: i32, %arg1: i32, %arg2: i32) -> (i32, i32) {
    %c0_i32 = arith.constant 0 : i32
    %c0_i32_0 = arith.constant 0 : i32
    return %c0_i32, %arg1 : i32, i32
  }
  func.func @transform_3(%arg0: i32, %arg1: i32, %arg2: i32) -> (i32, i32) {
    %c0_i32 = arith.constant 0 : i32
    return %arg0, %arg1 : i32, i32
  }
}

module attributes {stable_mosaic.version = 11 : i64} {
  func.func @_layernorm_kernel(%arg0: i32, %arg1: memref<16x32xf32, #tpu.memory_space<vmem>>, %arg2: memref<1x32xf32, #tpu.memory_space<vmem>>, %arg3: memref<1x32xf32, #tpu.memory_space<vmem>>, %arg4: memref<16x32xf32, #tpu.memory_space<vmem>>) attributes {dimension_semantics = [#tpu.dimension_semantics<parallel>], iteration_bounds = array<i64: 1>, scalar_prefetch = 0 : i64, scratch_operands = 0 : i64, tpu.core_type = #tpu.core_type<tc>, window_params = [{transform_indices = @transform_0, window_bounds = array<i64: 16, 32>}, {pipeline_mode = #tpu.pipeline_mode<synchronous>, transform_indices = @transform_1, window_bounds = array<i64: 1, 32>}, {pipeline_mode = #tpu.pipeline_mode<synchronous>, transform_indices = @transform_2, window_bounds = array<i64: 1, 32>}, {transform_indices = @transform_3, window_bounds = array<i64: 16, 32>}]} {
    %c0 = arith.constant 0 : index
    %c0_0 = arith.constant 0 : index
    %0 = vector.load %arg1[%c0, %c0_0] : memref<16x32xf32, #tpu.memory_space<vmem>>, vector<16x32xf32>
    %cst = arith.constant dense<0.000000e+00> : vector<16xf32>
    %1 = vector.multi_reduction <add>, %0, %cst [1] : vector<16x32xf32> to vector<16xf32>
    %2 = vector.shape_cast %1 : vector<16xf32> to vector<16x1xf32>
    %cst_1 = arith.constant 3.200000e+01 : f32
    %3 = vector.broadcast %cst_1 : f32 to vector<16x1xf32>
    %4 = arith.divf %2, %3 : vector<16x1xf32>
    %5 = vector.broadcast %4 : vector<16x1xf32> to vector<16x32xf32>
    %6 = arith.subf %0, %5 : vector<16x32xf32>
    %7 = arith.mulf %6, %6 : vector<16x32xf32>
    %cst_2 = arith.constant dense<0.000000e+00> : vector<16xf32>
    %8 = vector.multi_reduction <add>, %7, %cst_2 [1] : vector<16x32xf32> to vector<16xf32>
    %9 = vector.shape_cast %8 : vector<16xf32> to vector<16x1xf32>
    %cst_3 = arith.constant 3.200000e+01 : f32
    %10 = vector.broadcast %cst_3 : f32 to vector<16x1xf32>
    %11 = arith.divf %9, %10 : vector<16x1xf32>
    %12 = vector.broadcast %4 : vector<16x1xf32> to vector<16x32xf32>
    %13 = arith.subf %0, %12 : vector<16x32xf32>
    %cst_4 = arith.constant 9.99999974E-6 : f32
    %14 = vector.broadcast %cst_4 : f32 to vector<16x1xf32>
    %15 = arith.addf %11, %14 : vector<16x1xf32>
    %16 = math.rsqrt %15 : vector<16x1xf32>
    %17 = vector.broadcast %16 : vector<16x1xf32> to vector<16x32xf32>
    %18 = arith.mulf %13, %17 : vector<16x32xf32>
    %c0_5 = arith.constant 0 : index
    %c0_6 = arith.constant 0 : index
    %19 = vector.load %arg2[%c0_5, %c0_6] : memref<1x32xf32, #tpu.memory_space<vmem>>, vector<1x32xf32>
    %20 = vector.broadcast %19 : vector<1x32xf32> to vector<16x32xf32>
    %21 = arith.mulf %18, %20 : vector<16x32xf32>
    %c0_7 = arith.constant 0 : index
    %c0_8 = arith.constant 0 : index
    %22 = vector.load %arg3[%c0_7, %c0_8] : memref<1x32xf32, #tpu.memory_space<vmem>>, vector<1x32xf32>
    %23 = vector.broadcast %22 : vector<1x32xf32> to vector<16x32xf32>
    %24 = arith.addf %21, %23 : vector<16x32xf32>
    %c0_9 = arith.constant 0 : index
    %c0_10 = arith.constant 0 : index
    %25 = vector.load %arg4[%c0_9, %c0_10] : memref<16x32xf32, #tpu.memory_space<vmem>>, vector<16x32xf32>
    tpu.vector_store %arg4[%c0_9, %c0_10], %24 {strides = array<i32>} : memref<16x32xf32, #tpu.memory_space<vmem>>, vector<16x32xf32>,
    return
  }
  func.func @transform_0(%arg0: i32) -> (i32, i32) {
    %c0_i32 = arith.constant 0 : i32
    %c0_i32_0 = arith.constant 0 : i32
    return %arg0, %c0_i32 : i32, i32
  }
  func.func @transform_1(%arg0: i32) -> (i32, i32) {
    %c0_i32 = arith.constant 0 : i32
    %c0_i32_0 = arith.constant 0 : i32
    %c0_i32_1 = arith.constant 0 : i32
    return %c0_i32, %c0_i32_0 : i32, i32
  }
  func.func @transform_2(%arg0: i32) -> (i32, i32) {
    %c0_i32 = arith.constant 0 : i32
    %c0_i32_0 = arith.constant 0 : i32
    %c0_i32_1 = arith.constant 0 : i32
    return %c0_i32, %c0_i32_0 : i32, i32
  }
  func.func @transform_3(%arg0: i32) -> (i32, i32) {
    %c0_i32 = arith.constant 0 : i32
    %c0_i32_0 = arith.constant 0 : i32
    return %arg0, %c0_i32 : i32, i32
  }
}

module attributes {stable_mosaic.version = 11 : i64} {
  func.func @_linear_kernel(%arg0: i32, %arg1: i32, %arg2: i32, %arg3: memref<16x32xf32, #tpu.memory_space<vmem>>, %arg4: memref<32x128xbf16, #tpu.memory_space<vmem>>, %arg5: memref<1x128xf32, #tpu.memory_space<vmem>>, %arg6: memref<16x128xf32, #tpu.memory_space<vmem>>, %arg7: memref<16x128xf32, #tpu.memory_space<vmem>>) attributes {dimension_semantics = [#tpu.dimension_semantics<parallel>, #tpu.dimension_semantics<parallel>, #tpu.dimension_semantics<arbitrary>], iteration_bounds = array<i64: 1, 1, 1>, scalar_prefetch = 0 : i64, scratch_operands = 1 : i64, tpu.core_type = #tpu.core_type<tc>, window_params = [{transform_indices = @transform_0, window_bounds = array<i64: 16, 32>}, {transform_indices = @transform_1, window_bounds = array<i64: 32, 128>}, {transform_indices = @transform_2, window_bounds = array<i64: 1, 128>}, {transform_indices = @transform_3, window_bounds = array<i64: 16, 128>}]} {
    %c0_i32 = arith.constant 0 : i32
    %0 = arith.cmpi eq, %arg2, %c0_i32 : i32
    %1 = arith.extui %0 : i1 to i32
    %c0_i32_0 = arith.constant 0 : i32
    %2 = arith.cmpi ne, %1, %c0_i32_0 : i32
    scf.if %2 {
      %cst_10 = arith.constant 0.000000e+00 : f32
      %13 = vector.broadcast %cst_10 : f32 to vector<16x128xf32>
      %c0_11 = arith.constant 0 : index
      %c0_12 = arith.constant 0 : index
      %14 = vector.load %arg7[%c0_11, %c0_12] : memref<16x128xf32, #tpu.memory_space<vmem>>, vector<16x128xf32>
      tpu.vector_store %arg7[%c0_11, %c0_12], %13 {strides = array<i32>} : memref<16x128xf32, #tpu.memory_space<vmem>>, vector<16x128xf32>,
    } else {
    }
    %c0 = arith.constant 0 : index
    %c0_1 = arith.constant 0 : index
    %3 = vector.load %arg7[%c0, %c0_1] : memref<16x128xf32, #tpu.memory_space<vmem>>, vector<16x128xf32>
    %c0_2 = arith.constant 0 : index
    %c0_3 = arith.constant 0 : index
    %4 = vector.load %arg3[%c0_2, %c0_3] : memref<16x32xf32, #tpu.memory_space<vmem>>, vector<16x32xf32>
    %5 = arith.truncf %4 : vector<16x32xf32> to vector<16x32xbf16>
    %c0_4 = arith.constant 0 : index
    %c0_5 = arith.constant 0 : index
    %6 = vector.load %arg4[%c0_4, %c0_5] : memref<32x128xbf16, #tpu.memory_space<vmem>>, vector<32x128xbf16>
    %cst = arith.constant dense<0.000000e+00> : vector<16x128xf32>
    %7 = tpu.matmul %5, %6, %cst {dimension_numbers = #tpu.dot_dimension_numbers<[1], [0], [0], [1], [0, 0, 1, 1], [], []>} : vector<16x32xbf16>, vector<32x128xbf16>, vector<16x128xf32> -> vector<16x128xf32>
    %8 = arith.addf %3, %7 : vector<16x128xf32>
    %c0_6 = arith.constant 0 : index
    %c0_7 = arith.constant 0 : index
    %9 = vector.load %arg7[%c0_6, %c0_7] : memref<16x128xf32, #tpu.memory_space<vmem>>, vector<16x128xf32>
    tpu.vector_store %arg7[%c0_6, %c0_7], %8 {strides = array<i32>} : memref<16x128xf32, #tpu.memory_space<vmem>>, vector<16x128xf32>,
    %c0_i32_8 = arith.constant 0 : i32
    %10 = arith.cmpi eq, %arg2, %c0_i32_8 : i32
    %11 = arith.extui %10 : i1 to i32
    %c0_i32_9 = arith.constant 0 : i32
    %12 = arith.cmpi ne, %11, %c0_i32_9 : i32
    scf.if %12 {
      %c0_10 = arith.constant 0 : index
      %c0_11 = arith.constant 0 : index
      %13 = vector.load %arg7[%c0_10, %c0_11] : memref<16x128xf32, #tpu.memory_space<vmem>>, vector<16x128xf32>
      %c0_12 = arith.constant 0 : index
      %c0_13 = arith.constant 0 : index
      %14 = vector.load %arg5[%c0_12, %c0_13] : memref<1x128xf32, #tpu.memory_space<vmem>>, vector<1x128xf32>
      %15 = vector.broadcast %14 : vector<1x128xf32> to vector<16x128xf32>
      %16 = arith.addf %13, %15 : vector<16x128xf32>
      %c0_14 = arith.constant 0 : index
      %c0_15 = arith.constant 0 : index
      %17 = vector.load %arg6[%c0_14, %c0_15] : memref<16x128xf32, #tpu.memory_space<vmem>>, vector<16x128xf32>
      tpu.vector_store %arg6[%c0_14, %c0_15], %16 {strides = array<i32>} : memref<16x128xf32, #tpu.memory_space<vmem>>, vector<16x128xf32>,
    } else {
    }
    return
  }
  func.func @transform_0(%arg0: i32, %arg1: i32, %arg2: i32) -> (i32, i32) {
    %c0_i32 = arith.constant 0 : i32
    return %arg0, %arg2 : i32, i32
  }
  func.func @transform_1(%arg0: i32, %arg1: i32, %arg2: i32) -> (i32, i32) {
    %c0_i32 = arith.constant 0 : i32
    return %arg2, %arg1 : i32, i32
  }
  func.func @transform_2(%arg0: i32, %arg1: i32, %arg2: i32) -> (i32, i32) {
    %c0_i32 = arith.constant 0 : i32
    %c0_i32_0 = arith.constant 0 : i32
    return %c0_i32, %arg1 : i32, i32
  }
  func.func @transform_3(%arg0: i32, %arg1: i32, %arg2: i32) -> (i32, i32) {
    %c0_i32 = arith.constant 0 : i32
    return %arg0, %arg1 : i32, i32
  }
}

module attributes {stable_mosaic.version = 11 : i64} {
  func.func @_linear_add_ln_kernel(%arg0: i32, %arg1: i32, %arg2: memref<16x128xbf16, #tpu.memory_space<vmem>>, %arg3: memref<128x32xbf16, #tpu.memory_space<vmem>>, %arg4: memref<1x32xf32, #tpu.memory_space<vmem>>, %arg5: memref<16x32xf32, #tpu.memory_space<vmem>>, %arg6: memref<1x32xf32, #tpu.memory_space<vmem>>, %arg7: memref<1x32xf32, #tpu.memory_space<vmem>>, %arg8: memref<16x32xf32, #tpu.memory_space<vmem>>, %arg9: memref<16x32xf32, #tpu.memory_space<vmem>>) attributes {dimension_semantics = [#tpu.dimension_semantics<parallel>, #tpu.dimension_semantics<arbitrary>], iteration_bounds = array<i64: 1, 1>, scalar_prefetch = 0 : i64, scratch_operands = 1 : i64, tpu.core_type = #tpu.core_type<tc>, window_params = [{transform_indices = @transform_0, window_bounds = array<i64: 16, 128>}, {transform_indices = @transform_1, window_bounds = array<i64: 128, 32>}, {pipeline_mode = #tpu.pipeline_mode<synchronous>, transform_indices = @transform_2, window_bounds = array<i64: 1, 32>}, {transform_indices = @transform_3, window_bounds = array<i64: 16, 32>}, {pipeline_mode = #tpu.pipeline_mode<synchronous>, transform_indices = @transform_4, window_bounds = array<i64: 1, 32>}, {pipeline_mode = #tpu.pipeline_mode<synchronous>, transform_indices = @transform_5, window_bounds = array<i64: 1, 32>}, {transform_indices = @transform_6, window_bounds = array<i64: 16, 32>}]} {
    %c0_i32 = arith.constant 0 : i32
    %0 = arith.cmpi eq, %arg1, %c0_i32 : i32
    %1 = arith.extui %0 : i1 to i32
    %c0_i32_0 = arith.constant 0 : i32
    %2 = arith.cmpi ne, %1, %c0_i32_0 : i32
    scf.if %2 {
      %cst_10 = arith.constant 0.000000e+00 : f32
      %12 = vector.broadcast %cst_10 : f32 to vector<16x32xf32>
      %c0_11 = arith.constant 0 : index
      %c0_12 = arith.constant 0 : index
      %13 = vector.load %arg9[%c0_11, %c0_12] : memref<16x32xf32, #tpu.memory_space<vmem>>, vector<16x32xf32>
      tpu.vector_store %arg9[%c0_11, %c0_12], %12 {strides = array<i32>} : memref<16x32xf32, #tpu.memory_space<vmem>>, vector<16x32xf32>,
    } else {
    }
    %c0 = arith.constant 0 : index
    %c0_1 = arith.constant 0 : index
    %3 = vector.load %arg9[%c0, %c0_1] : memref<16x32xf32, #tpu.memory_space<vmem>>, vector<16x32xf32>
    %c0_2 = arith.constant 0 : index
    %c0_3 = arith.constant 0 : index
    %4 = vector.load %arg2[%c0_2, %c0_3] : memref<16x128xbf16, #tpu.memory_space<vmem>>, vector<16x128xbf16>
    %c0_4 = arith.constant 0 : index
    %c0_5 = arith.constant 0 : index
    %5 = vector.load %arg3[%c0_4, %c0_5] : memref<128x32xbf16, #tpu.memory_space<vmem>>, vector<128x32xbf16>
    %cst = arith.constant dense<0.000000e+00> : vector<16x32xf32>
    %6 = tpu.matmul %4, %5, %cst {dimension_numbers = #tpu.dot_dimension_numbers<[1], [0], [0], [1], [0, 0, 1, 1], [], []>} : vector<16x128xbf16>, vector<128x32xbf16>, vector<16x32xf32> -> vector<16x32xf32>
    %7 = arith.addf %3, %6 : vector<16x32xf32>
    %c0_6 = arith.constant 0 : index
    %c0_7 = arith.constant 0 : index
    %8 = vector.load %arg9[%c0_6, %c0_7] : memref<16x32xf32, #tpu.memory_space<vmem>>, vector<16x32xf32>
    tpu.vector_store %arg9[%c0_6, %c0_7], %7 {strides = array<i32>} : memref<16x32xf32, #tpu.memory_space<vmem>>, vector<16x32xf32>,
    %c0_i32_8 = arith.constant 0 : i32
    %9 = arith.cmpi eq, %arg1, %c0_i32_8 : i32
    %10 = arith.extui %9 : i1 to i32
    %c0_i32_9 = arith.constant 0 : i32
    %11 = arith.cmpi ne, %10, %c0_i32_9 : i32
    scf.if %11 {
      %c0_10 = arith.constant 0 : index
      %c0_11 = arith.constant 0 : index
      %12 = vector.load %arg9[%c0_10, %c0_11] : memref<16x32xf32, #tpu.memory_space<vmem>>, vector<16x32xf32>
      %c0_12 = arith.constant 0 : index
      %c0_13 = arith.constant 0 : index
      %13 = vector.load %arg4[%c0_12, %c0_13] : memref<1x32xf32, #tpu.memory_space<vmem>>, vector<1x32xf32>
      %14 = vector.broadcast %13 : vector<1x32xf32> to vector<16x32xf32>
      %15 = arith.addf %12, %14 : vector<16x32xf32>
      %c0_14 = arith.constant 0 : index
      %c0_15 = arith.constant 0 : index
      %16 = vector.load %arg5[%c0_14, %c0_15] : memref<16x32xf32, #tpu.memory_space<vmem>>, vector<16x32xf32>
      %17 = arith.addf %15, %16 : vector<16x32xf32>
      %cst_16 = arith.constant dense<0.000000e+00> : vector<16xf32>
      %18 = vector.multi_reduction <add>, %17, %cst_16 [1] : vector<16x32xf32> to vector<16xf32>
      %19 = vector.shape_cast %18 : vector<16xf32> to vector<16x1xf32>
      %cst_17 = arith.constant 3.200000e+01 : f32
      %20 = vector.broadcast %cst_17 : f32 to vector<16x1xf32>
      %21 = arith.divf %19, %20 : vector<16x1xf32>
      %22 = vector.broadcast %21 : vector<16x1xf32> to vector<16x32xf32>
      %23 = arith.subf %17, %22 : vector<16x32xf32>
      %24 = arith.mulf %23, %23 : vector<16x32xf32>
      %cst_18 = arith.constant dense<0.000000e+00> : vector<16xf32>
      %25 = vector.multi_reduction <add>, %24, %cst_18 [1] : vector<16x32xf32> to vector<16xf32>
      %26 = vector.shape_cast %25 : vector<16xf32> to vector<16x1xf32>
      %cst_19 = arith.constant 3.200000e+01 : f32
      %27 = vector.broadcast %cst_19 : f32 to vector<16x1xf32>
      %28 = arith.divf %26, %27 : vector<16x1xf32>
      %29 = vector.broadcast %21 : vector<16x1xf32> to vector<16x32xf32>
      %30 = arith.subf %17, %29 : vector<16x32xf32>
      %cst_20 = arith.constant 9.99999974E-6 : f32
      %31 = vector.broadcast %cst_20 : f32 to vector<16x1xf32>
      %32 = arith.addf %28, %31 : vector<16x1xf32>
      %33 = math.rsqrt %32 : vector<16x1xf32>
      %34 = vector.broadcast %33 : vector<16x1xf32> to vector<16x32xf32>
      %35 = arith.mulf %30, %34 : vector<16x32xf32>
      %c0_21 = arith.constant 0 : index
      %c0_22 = arith.constant 0 : index
      %36 = vector.load %arg6[%c0_21, %c0_22] : memref<1x32xf32, #tpu.memory_space<vmem>>, vector<1x32xf32>
      %37 = vector.broadcast %36 : vector<1x32xf32> to vector<16x32xf32>
      %38 = arith.mulf %35, %37 : vector<16x32xf32>
      %c0_23 = arith.constant 0 : index
      %c0_24 = arith.constant 0 : index
      %39 = vector.load %arg7[%c0_23, %c0_24] : memref<1x32xf32, #tpu.memory_space<vmem>>, vector<1x32xf32>
      %40 = vector.broadcast %39 : vector<1x32xf32> to vector<16x32xf32>
      %41 = arith.addf %38, %40 : vector<16x32xf32>
      %c0_25 = arith.constant 0 : index
      %c0_26 = arith.constant 0 : index
      %42 = vector.load %arg8[%c0_25, %c0_26] : memref<16x32xf32, #tpu.memory_space<vmem>>, vector<16x32xf32>
      tpu.vector_store %arg8[%c0_25, %c0_26], %41 {strides = array<i32>} : memref<16x32xf32, #tpu.memory_space<vmem>>, vector<16x32xf32>,
    } else {
    }
    return
  }
  func.func @transform_0(%arg0: i32, %arg1: i32) -> (i32, i32) {
    %c0_i32 = arith.constant 0 : i32
    return %arg0, %arg1 : i32, i32
  }
  func.func @transform_1(%arg0: i32, %arg1: i32) -> (i32, i32) {
    %c0_i32 = arith.constant 0 : i32
    %c0_i32_0 = arith.constant 0 : i32
    return %arg1, %c0_i32 : i32, i32
  }
  func.func @transform_2(%arg0: i32, %arg1: i32) -> (i32, i32) {
    %c0_i32 = arith.constant 0 : i32
    %c0_i32_0 = arith.constant 0 : i32
    %c0_i32_1 = arith.constant 0 : i32
    return %c0_i32, %c0_i32_0 : i32, i32
  }
  func.func @transform_3(%arg0: i32, %arg1: i32) -> (i32, i32) {
    %c0_i32 = arith.constant 0 : i32
    %c0_i32_0 = arith.constant 0 : i32
    return %arg0, %c0_i32 : i32, i32
  }
  func.func @transform_4(%arg0: i32, %arg1: i32) -> (i32, i32) {
    %c0_i32 = arith.constant 0 : i32
    %c0_i32_0 = arith.constant 0 : i32
    %c0_i32_1 = arith.constant 0 : i32
    return %c0_i32, %c0_i32_0 : i32, i32
  }
  func.func @transform_5(%arg0: i32, %arg1: i32) -> (i32, i32) {
    %c0_i32 = arith.constant 0 : i32
    %c0_i32_0 = arith.constant 0 : i32
    %c0_i32_1 = arith.constant 0 : i32
    return %c0_i32, %c0_i32_0 : i32, i32
  }
  func.func @transform_6(%arg0: i32, %arg1: i32) -> (i32, i32) {
    %c0_i32 = arith.constant 0 : i32
    %c0_i32_0 = arith.constant 0 : i32
    return %arg0, %c0_i32 : i32, i32
  }
}

</mosaic_0001>

<bundles_post_ra>
// kernel: seq2seq_transformer_forward.42
= control target key start
LH: loop header
LB: loop body
LE: loop exit
PB: predicated region body
PF: predicated region fallthrough
CT: control target
= control target key end

     0   :  { %v147_v0 = vmov 0.0   ;;  %vm148_vm0 = vmmov 0   ;;  %vm42_vm1 = vcmask 261120   ;;  %s187_s1 = inlined_call_operand.vmem [shape: bf16[32,128], index: 1, kind: input, shape index: {}]   ;;  %s188_s0 = inlined_call_operand.vmem [shape: f32[16,32], index: 0, kind: input, shape index: {}]   ;;  %s189_s2 = inlined_call_operand.vmem [shape: f32[1,128], index: 2, kind: input, shape index: {}]   ;;  %s190_s3 = inlined_call_operand.vmem [shape: bf16[16,128], index: 3, kind: output, shape index: {}]  }
   0x1   :  { %135 = vmatprep.subr.bf16.mxu0 %v147_v0  ;;  %v145_v1 = vld [vmem:[%s187_s1] sm:$0xff]   ;;  %139 = vmatprep.mubr.msk.bf16.mxu0 %vm148_vm0, %v147_v0  ;;  %v146_v2 = vld [vmem:[%s187_s1 + $0x8] sm:$0xff]  }
   0x2   :  { %136 = vmatpush3.bf16.msra.mxu0 %v145_v1  ;;  %v23_v3 = vld [vmem:[%s188_s0] sm:$0xff]  ;;  %v24_v4 = vld [vmem:[%s188_s0 + $0x8] sm:$0xff] }
   0x3   :  { %137 = vmatprep.subr.bf16.mxu0 %v147_v0  ;;  %v25_v5 = vpack.c.bf16 %v24_v4, %v23_v3  ;;  %v122_v7 = vld [vmem:[%s189_s2] ss:$0 sm:$0xff] }
   0x6   :  { %138 = vmatpush3.bf16.msra.mxu0 %v146_v2 }
   0x9   :  { %140 = vmatmul.mubr.msk.bf16.vlgmr.msra.gmra.mrb[0].mxu0 %vm42_vm1, %v25_v5 }
  0xdc   :  { %v80_v6 = vpop.f32.mrb[0].mxu0 }
  0xdd   :  { %v141_v8 = vpop.f32.mrb[1].mxu0  ;;  %v103_v10 = vadd.f32 %v122_v7, %v80_v6 }
  0xde   :  { %v83_v9 = vpop.f32.mrb[2].mxu0 }
  0xdf   :  { %v104_v11 = vadd.f32 %v122_v7, %v83_v9  ;;  %v142_v12 = vpop.f32.mrb[3].mxu0 }
  0xe1   :  { %v130_v13 = vpack.c.bf16 %v104_v11, %v103_v10 }
  0xe3   :  { %131 = vst [vmem:[%s190_s3] sm:$0xff] %v130_v13  }

// kernel: seq2seq_transformer_forward.43
= control target key start
LH: loop header
LB: loop body
LE: loop exit
PB: predicated region body
PF: predicated region fallthrough
CT: control target
= control target key end

     0   :  { %s864_s15 = smov 0   ;;  %s866_s16 = smov 0   ;;  %s941_s0 = inlined_call_operand.vmem [shape: bf16[2,4,8,8], index: 0, kind: input, shape index: {}]   ;;  %s942_s1 = inlined_call_operand.vmem [shape: bf16[2,4,8,8], index: 1, kind: input, shape index: {}]   ;;  %s943_s2 = inlined_call_operand.vmem [shape: bf16[2,4,8,8], index: 2, kind: input, shape index: {}]   ;;  %s944_s3 = inlined_call_operand.vmem [shape: f32[2,1,8], index: 3, kind: input, shape index: {}]   ;;  %s945_s4 = inlined_call_operand.vmem [shape: bf16[2,4,8,8], index: 4, kind: output, shape index: {}]  }
   0x1   :  { %s868_s17 = smov 0   ;;  %s870_s18 = smov 0  }
   0x2   :  { %s872_s19 = smov 0  }
   0x3 LB: > { %s36_s20 = sadd.s32 1, %s825_s17  ;;  %s40_s21 = sadd.s32 1, %s829_s18  ;;  %s833_s19 = sphi %s872_s19, %s14_s19   ;;  %s829_s18 = sphi %s870_s18, %s949_s18   ;;  %s825_s17 = sphi %s868_s17, %s948_s17   ;;  %s821_s16 = sphi %s866_s16, %s947_s16   ;;  %s817_s15 = sphi %s864_s15, %s946_s15  }
   0x4   : > { %p38_p0 = scmp.ge.s32.totalorder %s36_s20, 4  ;;  %p713_p1 = scmp.ge.s32.totalorder %s833_s19, 1 }
   0x5   : > { %p255_p2 = scmp.lt.s32.totalorder %s833_s19, 9 }
   0x6   : > { %s951_s20 = smov (%p38_p0, %s36_s20), 0  ;;  %s953_s21 = smov (!%p38_p0, %s40_s21), %s829_s18 }
   0x7   : > { %p256_p3 = pnand %p713_p1, %p255_p2  ;;  %p42_p4 = scmp.ge.s32.totalorder %s953_s21, 2 }
   0x8   : > { %p321_p5 = scmp.lt.s32.totalorder (!%p256_p3), %s821_s16, 1  ;;  %p323_p6 = scmp.lt.s32.totalorder (!%p256_p3), %s817_s15, 3  ;;  %vm379_vm0 = vcmask (!%p256_p3), 64512   ;;  %v835_v0 = vmov (!%p256_p3), 0.0   ;;  %vm836_vm1 = vmmov (!%p256_p3), 0   ;;  %vm376_vm2 = vcmask (!%p256_p3), 7168  }
   0x9   : > { %s955_s21 = smov (%p42_p4, %s953_s21), 0  ;;  %259 = sbr.rel (%p256_p3) target bundleno = 830 (0x33e), region = 36 }
   0xa   : > { %731 = vmatprep.subr.bf16.mxu0 (!%p256_p3), %v835_v0  ;;  %380 = vst.msk [vmem:[#allocation4] sm:$0xff] (!%p256_p3), %vm379_vm0, %v835_v0  ;;  %733 = vmatprep.mubr.msk.bf16.mxu0 (!%p256_p3), %vm836_vm1, %v835_v0  ;;  %v837_v7 = vmov (!%p256_p3), -inf   ;;  %v441_v8 = vlaneseq (!%p256_p3)  ;;  %v838_v19 = vmov (!%p256_p3), 0   ;;  %vm488_vm4 = vcmask (!%p256_p3), 1043456  }
   0xb   : > { %737 = vmatprep.subr.bf16.mxu1 (!%p256_p3), %v835_v0  ;;  %739 = vmatprep.mubr.msk.bf16.mxu1 (!%p256_p3), %vm836_vm1, %v835_v0  ;;  %377 = vst.msk [vmem:[#allocation2] sm:$0xff] (!%p256_p3), %vm376_vm2, %v837_v7  ;;  %378 = vst.msk [vmem:[#allocation3] sm:$0xff] (!%p256_p3), %vm376_vm2, %v835_v0  ;;  %vm548_vm5 = vcmask (!%p256_p3), 60416  }
   0xc   : > { %v442_v9 = vshrl.u32 (!%p256_p3), %v441_v8, 7  ;;  %v447_v10 = vand.u32 (!%p256_p3), 127, %v441_v8  ;;  %787 = vset.pattern.permute.xlu0 (!%p256_p3), %v838_v19  ;;  %788 = vset.pattern.permute.xlu1 (!%p256_p3), %v838_v19 }
   0xe   : > { %vm450_vm3 = vcmp.gt.s32.totalorder (!%p256_p3), %v447_v10, %v442_v9 }
  0x10   : > { %s957_s16 = smov (!%p321_p5, %s821_s16), 1  ;;  %s959_s15 = smov (!%p323_p6, %s817_s15), 3 }
  0x11   : > { %s714_s22 = sshll.u32 %s957_s16, 2  ;;  %s359_s7 = scalar_lea.vmem %s944_s3, %s957_s16  ;;  %v476_v40 = vld [vmem:[#allocation4] sm:$0xff] }
  0x12   : > { %s329_s23 = sadd.s32 %s714_s22, %s959_s15  ;;  %v722_v11 = vld [vmem:[%s359_s7] ss:$0 sm:$0xff]  ;;  %v468_v34 = vld [vmem:[#allocation3] sm:$0xff] }
  0x13   : > { %s895_s24 = sshll.u32 %s329_s23, 2  ;;  %v452_v20 = vld [vmem:[#allocation2] sm:$0xff] }
  0x14   : > { %s342_s27 = scalar_lea.vmem %s942_s1, %s895_s24  ;;  %s331_s30 = scalar_lea.vmem %s941_s0, %s895_s24 }
  0x15   : > { %v385_v1 = vld [vmem:[%s342_s27] sm:$0xf]  ;;  %s353_s10 = scalar_lea.vmem %s943_s2, %s895_s24  ;;  %s370_s13 = scalar_lea.vmem %s945_s4, %s895_s24 }
  0x16   : > { %v381_v2 = vld [vmem:[%s331_s30] sm:$0xf]  ;;  %v398_v3 = vsel %vm379_vm0, %v385_v1, 0 }
  0x17   : > { %v382_v4 = vunpack.c.l.bf16 %v381_v2  ;;  %732 = vmatpush3.bf16.xpose.msra.mxu0 %v398_v3  ;;  %v484_v24 = vld [vmem:[%s353_s10] sm:$0xf] }
  0x18   : > { %v490_v25 = vsel %vm488_vm4, %v484_v24, 0 }
  0x19   : > { %v383_v5 = vmul.f32 0.35355338, %v382_v4  ;;  %738 = vmatpush3.bf16.msra.mxu1 %v490_v25 }
  0x1b   : > { %v384_v6 = vpack.c.bf16 %v383_v5, %v383_v5 }
  0x1e   : > { %734 = vmatmul.mubr.msk.bf16.vlgmr.msra.gmra.mrb[0].mxu0 %vm379_vm0, %v384_v6 }
  0xf1   : > { %v434_v12 = vpop.f32.mrb[0].mxu0 }
  0xf2   : > { %v435_v13 = vadd.f32 %v722_v11, %v434_v12  ;;  %v735_v14 = vpop.f32.mrb[1].mxu0 }
  0xf3   : > { %v437_v15 = vpop.f32.mrb[2].mxu0 }
  0xf4   : > { %v736_v16 = vpop.f32.mrb[3].mxu0  ;;  %v451_v17 = vsel %vm450_vm3, -1e+30, %v435_v13 }
  0xf5   : > { %v453_v18 = vsel %vm379_vm0, %v451_v17, -inf }
  0xf6   : > { %454 = vmax.xlane.f32.xlu0 %v453_v18 }
 0x183   : > { %v455_v21 = vpop.xlane.xlu0 %454 }
 0x184   : > { %v456_v22 = vmax.f32 %v452_v20, %v455_v21 }
 0x186   : > { %v457_v23 = vsub.f32 %v452_v20, %v456_v22  ;;  %534 = vst.msk [vmem:[#allocation2] sm:$0xff] %vm376_vm2, %v456_v22  ;;  %462 = vperm.xlu0 %787, %v456_v22  }
 0x188   : > { %v458_v32 = vmul.f32 1.442695, %v457_v23 }
 0x205   : > { %v463_v26 = vpop.permute.xlu0 %462 }
 0x206   : > { %v465_v27 = vsub.f32 %v451_v17, %v463_v26 }
 0x208   : > { %v466_v28 = vmul.f32 1.442695, %v465_v27 }
 0x20a   : > { %789 = vpow2.f32 %v466_v28 }
 0x20b   : > { %791 = vpow2.f32 %v458_v32 }
 0x214   : > { %v790_v29 = vpop.eup %789 }
 0x215   : > { %v470_v30 = vsel %vm379_vm0, %v790_v29, 0.0  ;;  %v483_v31 = vpack.c.bf16 %v790_v29, %v790_v29  ;;  %v792_v33 = vpop.eup %791 }
 0x216   : > { %471 = vadd.xlane.f32.xlu1 %v470_v30  ;;  %v469_v35 = vmul.f32 %v792_v33, %v468_v34 }
 0x217   : > { %740 = vmatmul.mubr.msk.bf16.vlgmr.msra.gmra.mrb[0].mxu1 %vm379_vm0, %v483_v31 }
 0x227   : > { %479 = vperm.xlu1 %788, %v792_v33  }
 0x2a3   : > { %v472_v36 = vpop.xlane.xlu1 %471 }
 0x2a4   : > { %v473_v37 = vadd.f32 %v472_v36, %v469_v35 }
 0x2a6   : > { %475 = vst.msk [vmem:[#allocation3] sm:$0xff] %vm376_vm2, %v473_v37 }
 0x2a7   : > { %v480_v41 = vpop.permute.xlu1 %479 }
 0x2a8   : > { %v482_v42 = vmul.f32 %v480_v41, %v476_v40 }
 0x2ad   : > { %v539_v38 = vld [vmem:[#allocation3] sm:$0xff] }
 0x2ae   : > { %793 = vrcp.f32 %v539_v38 }
 0x2b8   : > { %v794_v39 = vpop.eup %793 }
 0x2b9   : > { %543 = vperm.xlu1 %788, %v794_v39  }
 0x2ea   : > { %v526_v43 = vpop.f32.mrb[0].mxu1 }
 0x2eb   : > { %v532_v44 = vadd.f32 %v526_v43, %v482_v42  ;;  %v741_v45 = vpop.f32.mrb[1].mxu1 }
 0x2ec   : > { %v529_v46 = vpop.f32.mrb[2].mxu1 }
 0x2ed   : > { %533 = vst.msk [vmem:[#allocation4] sm:$0xff] %vm379_vm0, %v532_v44  ;;  %v742_v47 = vpop.f32.mrb[3].mxu1 }
 0x2f4   : > { %v538_v48 = vld [vmem:[#allocation4] sm:$0xff] }
 0x338   : > { %v544_v49 = vpop.permute.xlu1 %543 }
 0x339   : > { %v546_v50 = vmul.f32 %v544_v49, %v538_v48 }
 0x33b   : > { %v547_v51 = vpack.c.bf16 %v546_v50, %v546_v50 }
 0x33d   : > { %549 = vst.msk [vmem:[%s370_s13] sm:$0xf] %vm548_vm5, %v547_v51 }
 0x33e PF: > { %s14_s19 = sadd.s32 1, %s833_s19   ;;  %s946_s15 = smov %s825_s17 }
 0x33f   : > { %p11_p7 = scmp.ge.s32.totalorder %s14_s19, 10   ;;  %s947_s16 = smov %s829_s18 }
 0x340   : > { %s948_s17 = smov %s951_s20  ;;  %s949_s18 = smov %s955_s21 }
 0x341   :  { %13 = sbr.rel (!%p11_p7) target bundleno = 3 (0x3), region = 83 }

// kernel: seq2seq_transformer_forward.44
= control target key start
LH: loop header
LB: loop body
LE: loop exit
PB: predicated region body
PF: predicated region fallthrough
CT: control target
= control target key end

     0   :  { %vm28_vm0 = vcmask 261120   ;;  %v201_v0 = vmov 0.0   ;;  %vm202_vm1 = vmmov 0   ;;  %s279_s1 = inlined_call_operand.vmem [shape: bf16[32,32], index: 1, kind: input, shape index: {}]   ;;  %s280_s0 = inlined_call_operand.vmem [shape: bf16[16,32], index: 0, kind: input, shape index: {}]   ;;  %s281_s2 = inlined_call_operand.vmem [shape: f32[1,32], index: 2, kind: input, shape index: {}]   ;;  %s282_s3 = inlined_call_operand.vmem [shape: f32[16,32], index: 3, kind: input, shape index: {}]   ;;  %s283_s4 = inlined_call_operand.vmem [shape: f32[1,32], index: 4, kind: input, shape index: {}]   ;;  %s284_s5 = inlined_call_operand.vmem [shape: f32[1,32], index: 5, kind: input, shape index: {}]   ;;  %s285_s6 = inlined_call_operand.vmem [shape: f32[16,32], index: 6, kind: output, shape index: {}]  }
   0x1   :  { %184 = vmatprep.subr.bf16.mxu0 %v201_v0  ;;  %v194_v1 = vld [vmem:[%s279_s1] sm:$0xff]   ;;  %188 = vmatprep.mubr.msk.bf16.mxu0 %vm202_vm1, %v201_v0  ;;  %29 = vst.msk [vmem:[#allocation2] sm:$0xff] %vm28_vm0, %v201_v0  ;;  %30 = vst.msk [vmem:[#allocation2 + $0x8] sm:$0xff] %vm28_vm0, %v201_v0  ;;  %v195_v2 = vld [vmem:[%s279_s1 + $0x8] sm:$0xff]  }
   0x2   :  { %185 = vmatpush3.bf16.msra.mxu0 %v194_v1  ;;  %v196_v3 = vld [vmem:[%s280_s0] sm:$0xff]   ;;  %v120_v17 = vld [vmem:[%s282_s3 + $0x8] sm:$0xff] }
   0x3   :  { %186 = vmatprep.subr.bf16.mxu0 %v201_v0  ;;  %v178_v12 = vld [vmem:[%s281_s2] ss:$0 sm:$0xff] }
   0x4   :  { %v119_v14 = vld [vmem:[%s282_s3] sm:$0xff] }
   0x5   :  { %v179_v40 = vld [vmem:[%s283_s4] ss:$0 sm:$0xff] }
   0x6   :  { %187 = vmatpush3.bf16.msra.mxu0 %v195_v2  ;;  %v180_v42 = vld [vmem:[%s284_s5] ss:$0 sm:$0xff] }
   0x8   :  { %v31_v4 = vld [vmem:[#allocation2] sm:$0xff]  ;;  %v32_v6 = vld [vmem:[#allocation2 + $0x8] sm:$0xff] }
   0x9   :  { %189 = vmatmul.mubr.msk.bf16.vlgmr.msra.gmra.mrb[0].mxu0 %vm28_vm0, %v196_v3 }
  0xdc   :  { %v94_v5 = vpop.f32.mrb[0].mxu0 }
  0xdd   :  { %v101_v7 = vadd.f32 %v94_v5, %v31_v4  ;;  %v190_v8 = vpop.f32.mrb[1].mxu0 }
  0xde   :  { %v97_v9 = vpop.f32.mrb[2].mxu0 }
  0xdf   :  { %103 = vst.msk [vmem:[#allocation2] sm:$0xff] %vm28_vm0, %v101_v7  ;;  %v102_v10 = vadd.f32 %v97_v9, %v32_v6  ;;  %v191_v11 = vpop.f32.mrb[3].mxu0 }
  0xe1   :  { %104 = vst.msk [vmem:[#allocation2 + $0x8] sm:$0xff] %vm28_vm0, %v102_v10 }
  0xe6   :  { %v108_v13 = vld [vmem:[#allocation2] sm:$0xff] }
  0xe7   :  { %v117_v15 = vadd.f32 %v178_v12, %v108_v13 }
  0xe8   :  { %v109_v16 = vld [vmem:[#allocation2 + $0x8] sm:$0xff] }
  0xe9   :  { %v121_v18 = vadd.f32 %v119_v14, %v117_v15  ;;  %v118_v19 = vadd.f32 %v178_v12, %v109_v16 }
  0xeb   :  { %v123_v20 = vsel %vm28_vm0, %v121_v18, 0.0  ;;  %v122_v21 = vadd.f32 %v120_v17, %v118_v19 }
  0xec   :  { %124 = vadd.xlane.f32.xlu0 %v123_v20 }
  0xed   :  { %v126_v22 = vsel %vm28_vm0, %v122_v21, 0.0 }
  0xf0   :  { %127 = vadd.xlane.f32.xlu0 %v126_v22 }
 0x179   :  { %v125_v23 = vpop.xlane.xlu0 %124 }
 0x17a   :  { %v130_v24 = vmul.f32 0.03125, %v125_v23 }
 0x17c   :  { %v132_v25 = vsub.f32 %v121_v18, %v130_v24 }
 0x17d   :  { %v128_v26 = vpop.xlane.xlu0 %127 }
 0x17e   :  { %v131_v27 = vmul.f32 0.03125, %v128_v26  ;;  %v134_v28 = vmul.f32 %v132_v25, %v132_v25 }
 0x180   :  { %v133_v29 = vsub.f32 %v122_v21, %v131_v27  ;;  %v136_v30 = vsel %vm28_vm0, %v134_v28, 0.0 }
 0x181   :  { %137 = vadd.xlane.f32.xlu1 %v136_v30 }
 0x182   :  { %v135_v31 = vmul.f32 %v133_v29, %v133_v29 }
 0x184   :  { %v139_v32 = vsel %vm28_vm0, %v135_v31, 0.0 }
 0x185   :  { %140 = vadd.xlane.f32.xlu1 %v139_v32 }
 0x20e   :  { %v138_v33 = vpop.xlane.xlu1 %137 }
 0x20f   :  { %v142_v34 = vmul.f32 0.03125, %v138_v33 }
 0x211   :  { %v144_v35 = vadd.f32 1e-05, %v142_v34 }
 0x212   :  { %v141_v36 = vpop.xlane.xlu1 %140 }
 0x213   :  { %197 = vrsqrt.f32 %v144_v35  ;;  %v143_v37 = vmul.f32 0.03125, %v141_v36 }
 0x215   :  { %v145_v38 = vadd.f32 1e-05, %v143_v37 }
 0x217   :  { %199 = vrsqrt.f32 %v145_v38 }
 0x21d   :  { %v198_v39 = vpop.eup %197 }
 0x21e   :  { %v148_v41 = vmul.f32 %v198_v39, %v132_v25 }
 0x220   :  { %v157_v43 = vmul.f32 %v179_v40, %v148_v41 }
 0x221   :  { %v200_v44 = vpop.eup %199 }
 0x222   :  { %v166_v45 = vadd.f32 %v180_v42, %v157_v43  ;;  %v149_v46 = vmul.f32 %v200_v44, %v133_v29 }
 0x224   :  { %168 = vst.msk [vmem:[%s285_s6] sm:$0xff] %vm28_vm0, %v166_v45  ;;  %v158_v47 = vmul.f32 %v179_v40, %v149_v46 }
 0x226   :  { %v167_v48 = vadd.f32 %v180_v42, %v158_v47 }
 0x228   :  { %169 = vst.msk [vmem:[%s285_s6 + $0x8] sm:$0xff] %vm28_vm0, %v167_v48 }

// kernel: seq2seq_transformer_forward.32
= control target key start
LH: loop header
LB: loop body
LE: loop exit
PB: predicated region body
PF: predicated region fallthrough
CT: control target
= control target key end

     0   :  { %s852_s15 = smov 0   ;;  %s854_s16 = smov 0   ;;  %s929_s0 = inlined_call_operand.vmem [shape: bf16[2,4,8,8], index: 0, kind: input, shape index: {}]   ;;  %s930_s1 = inlined_call_operand.vmem [shape: bf16[2,4,8,8], index: 1, kind: input, shape index: {}]   ;;  %s931_s2 = inlined_call_operand.vmem [shape: bf16[2,4,8,8], index: 2, kind: input, shape index: {}]   ;;  %s932_s3 = inlined_call_operand.vmem [shape: f32[2,1,8], index: 3, kind: input, shape index: {}]   ;;  %s933_s4 = inlined_call_operand.vmem [shape: bf16[2,4,8,8], index: 4, kind: output, shape index: {}]  }
   0x1   :  { %s856_s17 = smov 0   ;;  %s858_s18 = smov 0  }
   0x2   :  { %s860_s19 = smov 0  }
   0x3 LB: > { %s36_s20 = sadd.s32 1, %s813_s17  ;;  %s40_s21 = sadd.s32 1, %s817_s18  ;;  %s821_s19 = sphi %s860_s19, %s14_s19   ;;  %s817_s18 = sphi %s858_s18, %s937_s18   ;;  %s813_s17 = sphi %s856_s17, %s936_s17   ;;  %s809_s16 = sphi %s854_s16, %s935_s16   ;;  %s805_s15 = sphi %s852_s15, %s934_s15  }
   0x4   : > { %p38_p0 = scmp.ge.s32.totalorder %s36_s20, 4  ;;  %p701_p1 = scmp.ge.s32.totalorder %s821_s19, 1 }
   0x5   : > { %p255_p2 = scmp.lt.s32.totalorder %s821_s19, 9 }
   0x6   : > { %s939_s20 = smov (%p38_p0, %s36_s20), 0  ;;  %s941_s21 = smov (!%p38_p0, %s40_s21), %s817_s18 }
   0x7   : > { %p256_p3 = pnand %p701_p1, %p255_p2  ;;  %p42_p4 = scmp.ge.s32.totalorder %s941_s21, 2 }
   0x8   : > { %p321_p5 = scmp.lt.s32.totalorder (!%p256_p3), %s809_s16, 1  ;;  %p323_p6 = scmp.lt.s32.totalorder (!%p256_p3), %s805_s15, 3  ;;  %vm379_vm0 = vcmask (!%p256_p3), 64512   ;;  %v823_v0 = vmov (!%p256_p3), 0.0   ;;  %vm824_vm1 = vmmov (!%p256_p3), 0   ;;  %vm376_vm2 = vcmask (!%p256_p3), 7168  }
   0x9   : > { %s943_s21 = smov (%p42_p4, %s941_s21), 0  ;;  %259 = sbr.rel (%p256_p3) target bundleno = 829 (0x33d), region = 36 }
   0xa   : > { %719 = vmatprep.subr.bf16.mxu0 (!%p256_p3), %v823_v0  ;;  %380 = vst.msk [vmem:[#allocation4] sm:$0xff] (!%p256_p3), %vm379_vm0, %v823_v0  ;;  %721 = vmatprep.mubr.msk.bf16.mxu0 (!%p256_p3), %vm824_vm1, %v823_v0  ;;  %v825_v7 = vmov (!%p256_p3), -inf   ;;  %v826_v15 = vmov (!%p256_p3), 0   ;;  %vm476_vm3 = vcmask (!%p256_p3), 1043456   ;;  %vm536_vm4 = vcmask (!%p256_p3), 60416  }
   0xb   : > { %725 = vmatprep.subr.bf16.mxu1 (!%p256_p3), %v823_v0  ;;  %727 = vmatprep.mubr.msk.bf16.mxu1 (!%p256_p3), %vm824_vm1, %v823_v0  ;;  %377 = vst.msk [vmem:[#allocation2] sm:$0xff] (!%p256_p3), %vm376_vm2, %v825_v7  ;;  %378 = vst.msk [vmem:[#allocation3] sm:$0xff] (!%p256_p3), %vm376_vm2, %v823_v0 }
   0xc   : > { %775 = vset.pattern.permute.xlu0 (!%p256_p3), %v826_v15  ;;  %776 = vset.pattern.permute.xlu1 (!%p256_p3), %v826_v15 }
  0x10   : > { %s945_s16 = smov (!%p321_p5, %s809_s16), 1  ;;  %s947_s15 = smov (!%p323_p6, %s805_s15), 3 }
  0x11   : > { %s702_s22 = sshll.u32 %s945_s16, 2  ;;  %s359_s7 = scalar_lea.vmem %s932_s3, %s945_s16  ;;  %v464_v36 = vld [vmem:[#allocation4] sm:$0xff] }
  0x12   : > { %s329_s23 = sadd.s32 %s702_s22, %s947_s15  ;;  %v710_v8 = vld [vmem:[%s359_s7] ss:$0 sm:$0xff]  ;;  %v456_v30 = vld [vmem:[#allocation3] sm:$0xff] }
  0x13   : > { %s883_s24 = sshll.u32 %s329_s23, 2  ;;  %v440_v16 = vld [vmem:[#allocation2] sm:$0xff] }
  0x14   : > { %s342_s27 = scalar_lea.vmem %s930_s1, %s883_s24  ;;  %s331_s30 = scalar_lea.vmem %s929_s0, %s883_s24 }
  0x15   : > { %v385_v1 = vld [vmem:[%s342_s27] sm:$0xf]  ;;  %s353_s10 = scalar_lea.vmem %s931_s2, %s883_s24  ;;  %s370_s13 = scalar_lea.vmem %s933_s4, %s883_s24 }
  0x16   : > { %v381_v2 = vld [vmem:[%s331_s30] sm:$0xf]  ;;  %v398_v3 = vsel %vm379_vm0, %v385_v1, 0 }
  0x17   : > { %v382_v4 = vunpack.c.l.bf16 %v381_v2  ;;  %720 = vmatpush3.bf16.xpose.msra.mxu0 %v398_v3  ;;  %v472_v20 = vld [vmem:[%s353_s10] sm:$0xf] }
  0x18   : > { %v478_v21 = vsel %vm476_vm3, %v472_v20, 0 }
  0x19   : > { %v383_v5 = vmul.f32 0.35355338, %v382_v4  ;;  %726 = vmatpush3.bf16.msra.mxu1 %v478_v21 }
  0x1b   : > { %v384_v6 = vpack.c.bf16 %v383_v5, %v383_v5 }
  0x1e   : > { %722 = vmatmul.mubr.msk.bf16.vlgmr.msra.gmra.mrb[0].mxu0 %vm379_vm0, %v384_v6 }
  0xf1   : > { %v434_v9 = vpop.f32.mrb[0].mxu0 }
  0xf2   : > { %v435_v10 = vadd.f32 %v710_v8, %v434_v9  ;;  %v723_v11 = vpop.f32.mrb[1].mxu0 }
  0xf3   : > { %v437_v12 = vpop.f32.mrb[2].mxu0 }
  0xf4   : > { %v724_v13 = vpop.f32.mrb[3].mxu0  ;;  %v441_v14 = vsel %vm379_vm0, %v435_v10, -inf }
  0xf5   : > { %442 = vmax.xlane.f32.xlu0 %v441_v14 }
 0x182   : > { %v443_v17 = vpop.xlane.xlu0 %442 }
 0x183   : > { %v444_v18 = vmax.f32 %v440_v16, %v443_v17 }
 0x185   : > { %v445_v19 = vsub.f32 %v440_v16, %v444_v18  ;;  %522 = vst.msk [vmem:[#allocation2] sm:$0xff] %vm376_vm2, %v444_v18  ;;  %450 = vperm.xlu0 %775, %v444_v18  }
 0x187   : > { %v446_v28 = vmul.f32 1.442695, %v445_v19 }
 0x204   : > { %v451_v22 = vpop.permute.xlu0 %450 }
 0x205   : > { %v453_v23 = vsub.f32 %v435_v10, %v451_v22 }
 0x207   : > { %v454_v24 = vmul.f32 1.442695, %v453_v23 }
 0x209   : > { %777 = vpow2.f32 %v454_v24 }
 0x20a   : > { %779 = vpow2.f32 %v446_v28 }
 0x213   : > { %v778_v25 = vpop.eup %777 }
 0x214   : > { %v458_v26 = vsel %vm379_vm0, %v778_v25, 0.0  ;;  %v471_v27 = vpack.c.bf16 %v778_v25, %v778_v25  ;;  %v780_v29 = vpop.eup %779 }
 0x215   : > { %459 = vadd.xlane.f32.xlu1 %v458_v26  ;;  %v457_v31 = vmul.f32 %v780_v29, %v456_v30 }
 0x216   : > { %728 = vmatmul.mubr.msk.bf16.vlgmr.msra.gmra.mrb[0].mxu1 %vm379_vm0, %v471_v27 }
 0x226   : > { %467 = vperm.xlu1 %776, %v780_v29  }
 0x2a2   : > { %v460_v32 = vpop.xlane.xlu1 %459 }
 0x2a3   : > { %v461_v33 = vadd.f32 %v460_v32, %v457_v31 }
 0x2a5   : > { %463 = vst.msk [vmem:[#allocation3] sm:$0xff] %vm376_vm2, %v461_v33 }
 0x2a6   : > { %v468_v37 = vpop.permute.xlu1 %467 }
 0x2a7   : > { %v470_v38 = vmul.f32 %v468_v37, %v464_v36 }
 0x2ac   : > { %v527_v34 = vld [vmem:[#allocation3] sm:$0xff] }
 0x2ad   : > { %781 = vrcp.f32 %v527_v34 }
 0x2b7   : > { %v782_v35 = vpop.eup %781 }
 0x2b8   : > { %531 = vperm.xlu1 %776, %v782_v35  }
 0x2e9   : > { %v514_v39 = vpop.f32.mrb[0].mxu1 }
 0x2ea   : > { %v520_v40 = vadd.f32 %v514_v39, %v470_v38  ;;  %v729_v41 = vpop.f32.mrb[1].mxu1 }
 0x2eb   : > { %v517_v42 = vpop.f32.mrb[2].mxu1 }
 0x2ec   : > { %521 = vst.msk [vmem:[#allocation4] sm:$0xff] %vm379_vm0, %v520_v40  ;;  %v730_v43 = vpop.f32.mrb[3].mxu1 }
 0x2f3   : > { %v526_v44 = vld [vmem:[#allocation4] sm:$0xff] }
 0x337   : > { %v532_v45 = vpop.permute.xlu1 %531 }
 0x338   : > { %v534_v46 = vmul.f32 %v532_v45, %v526_v44 }
 0x33a   : > { %v535_v47 = vpack.c.bf16 %v534_v46, %v534_v46 }
 0x33c   : > { %537 = vst.msk [vmem:[%s370_s13] sm:$0xf] %vm536_vm4, %v535_v47 }
 0x33d PF: > { %s14_s19 = sadd.s32 1, %s821_s19   ;;  %s934_s15 = smov %s813_s17 }
 0x33e   : > { %p11_p7 = scmp.ge.s32.totalorder %s14_s19, 10   ;;  %s935_s16 = smov %s817_s18 }
 0x33f   : > { %s936_s17 = smov %s939_s20  ;;  %s937_s18 = smov %s943_s21 }
 0x340   :  { %13 = sbr.rel (!%p11_p7) target bundleno = 3 (0x3), region = 83 }

// kernel: seq2seq_transformer_forward.34
= control target key start
LH: loop header
LB: loop body
LE: loop exit
PB: predicated region body
PF: predicated region fallthrough
CT: control target
= control target key end

     0   :  { %v149_v0 = vmov 0.0   ;;  %vm150_vm0 = vmmov 0   ;;  %vm42_vm1 = vcmask 261120   ;;  %s189_s1 = inlined_call_operand.vmem [shape: bf16[32,128], index: 1, kind: input, shape index: {}]   ;;  %s190_s0 = inlined_call_operand.vmem [shape: f32[16,32], index: 0, kind: input, shape index: {}]   ;;  %s191_s2 = inlined_call_operand.vmem [shape: f32[1,128], index: 2, kind: input, shape index: {}]   ;;  %s192_s3 = inlined_call_operand.vmem [shape: bf16[16,128], index: 3, kind: output, shape index: {}]  }
   0x1   :  { %137 = vmatprep.subr.bf16.mxu0 %v149_v0  ;;  %v147_v1 = vld [vmem:[%s189_s1] sm:$0xff]   ;;  %141 = vmatprep.mubr.msk.bf16.mxu0 %vm150_vm0, %v149_v0  ;;  %v148_v2 = vld [vmem:[%s189_s1 + $0x8] sm:$0xff]  }
   0x2   :  { %138 = vmatpush3.bf16.msra.mxu0 %v147_v1  ;;  %v23_v3 = vld [vmem:[%s190_s0] sm:$0xff]  ;;  %v24_v4 = vld [vmem:[%s190_s0 + $0x8] sm:$0xff] }
   0x3   :  { %139 = vmatprep.subr.bf16.mxu0 %v149_v0  ;;  %v25_v5 = vpack.c.bf16 %v24_v4, %v23_v3  ;;  %v124_v6 = vld [vmem:[%s191_s2] ss:$0 sm:$0xff] }
   0x6   :  { %140 = vmatpush3.bf16.msra.mxu0 %v148_v2 }
   0x9   :  { %142 = vmatmul.mubr.msk.bf16.vlgmr.msra.gmra.mrb[0].mxu0 %vm42_vm1, %v25_v5 }
  0xdc   :  { %v80_v7 = vpop.f32.mrb[0].mxu0 }
  0xdd   :  { %v103_v8 = vadd.f32 %v124_v6, %v80_v7  ;;  %v143_v9 = vpop.f32.mrb[1].mxu0 }
  0xde   :  { %v83_v10 = vpop.f32.mrb[2].mxu0 }
  0xdf   :  { %v104_v11 = vadd.f32 %v124_v6, %v83_v10  ;;  %v144_v12 = vpop.f32.mrb[3].mxu0  ;;  %v105_v13 = vmax.f32 %v103_v8, 0.0 }
  0xe1   :  { %v106_v14 = vmax.f32 %v104_v11, 0.0 }
  0xe3   :  { %v132_v15 = vpack.c.bf16 %v106_v14, %v105_v13 }
  0xe5   :  { %133 = vst [vmem:[%s192_s3] sm:$0xff] %v132_v15  }

// kernel: seq2seq_transformer_forward.41
= control target key start
LH: loop header
LB: loop body
LE: loop exit
PB: predicated region body
PF: predicated region fallthrough
CT: control target
= control target key end

     0   :  { %vm16_vm0 = vcmask 261120   ;;  %s118_s0 = inlined_call_operand.vmem [shape: f32[16,32], index: 0, kind: input, shape index: {}]   ;;  %s119_s1 = inlined_call_operand.vmem [shape: f32[1,32], index: 1, kind: input, shape index: {}]   ;;  %s120_s2 = inlined_call_operand.vmem [shape: f32[1,32], index: 2, kind: input, shape index: {}]   ;;  %s121_s3 = inlined_call_operand.vmem [shape: f32[16,32], index: 3, kind: output, shape index: {}]  }
   0x1   :  { %v14_v0 = vld [vmem:[%s118_s0] sm:$0xff]  ;;  %v15_v1 = vld [vmem:[%s118_s0 + $0x8] sm:$0xff] }
   0x2   :  { %v17_v2 = vsel %vm16_vm0, %v14_v0, 0.0  ;;  %v20_v3 = vsel %vm16_vm0, %v15_v1, 0.0  ;;  %v68_v21 = vld [vmem:[%s119_s1] ss:$0 sm:$0xff] }
   0x3   :  { %18 = vadd.xlane.f32.xlu0 %v17_v2  ;;  %v69_v23 = vld [vmem:[%s120_s2] ss:$0 sm:$0xff] }
   0x7   :  { %21 = vadd.xlane.f32.xlu0 %v20_v3 }
  0x90   :  { %v19_v4 = vpop.xlane.xlu0 %18 }
  0x91   :  { %v24_v5 = vmul.f32 0.03125, %v19_v4 }
  0x93   :  { %v26_v6 = vsub.f32 %v14_v0, %v24_v5 }
  0x94   :  { %v22_v7 = vpop.xlane.xlu0 %21 }
  0x95   :  { %v25_v8 = vmul.f32 0.03125, %v22_v7  ;;  %v28_v9 = vmul.f32 %v26_v6, %v26_v6 }
  0x97   :  { %v27_v10 = vsub.f32 %v15_v1, %v25_v8  ;;  %v30_v11 = vsel %vm16_vm0, %v28_v9, 0.0 }
  0x98   :  { %31 = vadd.xlane.f32.xlu1 %v30_v11 }
  0x99   :  { %v29_v12 = vmul.f32 %v27_v10, %v27_v10 }
  0x9b   :  { %v33_v13 = vsel %vm16_vm0, %v29_v12, 0.0 }
  0x9c   :  { %34 = vadd.xlane.f32.xlu1 %v33_v13 }
 0x125   :  { %v32_v14 = vpop.xlane.xlu1 %31 }
 0x126   :  { %v36_v15 = vmul.f32 0.03125, %v32_v14 }
 0x128   :  { %v38_v16 = vadd.f32 1e-05, %v36_v15 }
 0x129   :  { %v35_v17 = vpop.xlane.xlu1 %34 }
 0x12a   :  { %70 = vrsqrt.f32 %v38_v16  ;;  %v37_v18 = vmul.f32 0.03125, %v35_v17 }
 0x12c   :  { %v39_v19 = vadd.f32 1e-05, %v37_v18 }
 0x12e   :  { %72 = vrsqrt.f32 %v39_v19 }
 0x134   :  { %v71_v20 = vpop.eup %70 }
 0x135   :  { %v42_v22 = vmul.f32 %v71_v20, %v26_v6 }
 0x137   :  { %v51_v24 = vmul.f32 %v68_v21, %v42_v22 }
 0x138   :  { %v73_v25 = vpop.eup %72 }
 0x139   :  { %v60_v26 = vadd.f32 %v69_v23, %v51_v24  ;;  %v43_v27 = vmul.f32 %v73_v25, %v27_v10 }
 0x13b   :  { %62 = vst.msk [vmem:[%s121_s3] sm:$0xff] %vm16_vm0, %v60_v26  ;;  %v52_v28 = vmul.f32 %v68_v21, %v43_v27 }
 0x13d   :  { %v61_v29 = vadd.f32 %v69_v23, %v52_v28 }
 0x13f   :  { %63 = vst.msk [vmem:[%s121_s3 + $0x8] sm:$0xff] %vm16_vm0, %v61_v29 }

// kernel: seq2seq_transformer_forward.61
= control target key start
LH: loop header
LB: loop body
LE: loop exit
PB: predicated region body
PF: predicated region fallthrough
CT: control target
= control target key end

     0   :  { %v130_v0 = vmov 0.0   ;;  %vm131_vm0 = vmmov 0   ;;  %vm42_vm1 = vcmask 261120   ;;  %s173_s1 = inlined_call_operand.vmem [shape: bf16[32,128], index: 1, kind: input, shape index: {}]   ;;  %s174_s0 = inlined_call_operand.vmem [shape: f32[16,32], index: 0, kind: input, shape index: {}]   ;;  %s175_s2 = inlined_call_operand.vmem [shape: f32[1,128], index: 2, kind: input, shape index: {}]   ;;  %s176_s3 = inlined_call_operand.vmem [shape: f32[16,128], index: 3, kind: output, shape index: {}]  }
   0x1   :  { %118 = vmatprep.subr.bf16.mxu0 %v130_v0  ;;  %v128_v1 = vld [vmem:[%s173_s1] sm:$0xff]   ;;  %122 = vmatprep.mubr.msk.bf16.mxu0 %vm131_vm0, %v130_v0  ;;  %v129_v2 = vld [vmem:[%s173_s1 + $0x8] sm:$0xff]  }
   0x2   :  { %119 = vmatpush3.bf16.msra.mxu0 %v128_v1  ;;  %v23_v3 = vld [vmem:[%s174_s0] sm:$0xff]  ;;  %v24_v4 = vld [vmem:[%s174_s0 + $0x8] sm:$0xff] }
   0x3   :  { %120 = vmatprep.subr.bf16.mxu0 %v130_v0  ;;  %v25_v5 = vpack.c.bf16 %v24_v4, %v23_v3  ;;  %v114_v6 = vld [vmem:[%s175_s2] ss:$0 sm:$0xff] }
   0x6   :  { %121 = vmatpush3.bf16.msra.mxu0 %v129_v2 }
   0x9   :  { %123 = vmatmul.mubr.msk.bf16.vlgmr.msra.gmra.mrb[0].mxu0 %vm42_vm1, %v25_v5 }
  0xdc   :  { %v80_v7 = vpop.f32.mrb[0].mxu0 }
  0xdd   :  { %v103_v8 = vadd.f32 %v114_v6, %v80_v7  ;;  %v124_v9 = vpop.f32.mrb[1].mxu0 }
  0xde   :  { %v83_v10 = vpop.f32.mrb[2].mxu0 }
  0xdf   :  { %105 = vst [vmem:[%s176_s3] sm:$0xff] %v103_v8  ;;  %v104_v11 = vadd.f32 %v114_v6, %v83_v10  ;;  %v125_v12 = vpop.f32.mrb[3].mxu0 }
  0xe1   :  { %106 = vst [vmem:[%s176_s3 + $0x8] sm:$0xff] %v104_v11 }

// kernel: seq2seq_transformer_forward.35
= control target key start
LH: loop header
LB: loop body
LE: loop exit
PB: predicated region body
PF: predicated region fallthrough
CT: control target
= control target key end

     0   :  { %vm28_vm0 = vcmask 261120   ;;  %v276_v0 = vmov 0.0   ;;  %vm277_vm1 = vmmov 0   ;;  %s371_s1 = inlined_call_operand.vmem [shape: bf16[128,32], index: 1, kind: input, shape index: {}]   ;;  %s372_s0 = inlined_call_operand.vmem [shape: bf16[16,128], index: 0, kind: input, shape index: {}]   ;;  %s373_s2 = inlined_call_operand.vmem [shape: f32[1,32], index: 2, kind: input, shape index: {}]   ;;  %s374_s3 = inlined_call_operand.vmem [shape: f32[16,32], index: 3, kind: input, shape index: {}]   ;;  %s375_s4 = inlined_call_operand.vmem [shape: f32[1,32], index: 4, kind: input, shape index: {}]   ;;  %s376_s5 = inlined_call_operand.vmem [shape: f32[1,32], index: 5, kind: input, shape index: {}]   ;;  %s377_s6 = inlined_call_operand.vmem [shape: f32[16,32], index: 6, kind: output, shape index: {}]  }
   0x1   :  { %241 = vmatprep.subr.bf16.mxu0 %v276_v0  ;;  %v263_v1 = vld [vmem:[%s371_s1] sm:$0xff]   ;;  %257 = vmatprep.mubr.msk.bf16.mxu0 %vm277_vm1, %v276_v0  ;;  %29 = vst.msk [vmem:[#allocation2] sm:$0xff] %vm28_vm0, %v276_v0  ;;  %30 = vst.msk [vmem:[#allocation2 + $0x8] sm:$0xff] %vm28_vm0, %v276_v0  ;;  %v264_v2 = vld [vmem:[%s371_s1 + $0x8] sm:$0xff]  }
   0x2   :  { %242 = vmatpush3.bf16.msra.mxu0 %v263_v1  ;;  %v265_v3 = vld [vmem:[%s371_s1 + $0x10] sm:$0xff]   ;;  %v266_v4 = vld [vmem:[%s371_s1 + $0x18] sm:$0xff]   ;;  %v267_v5 = vld [vmem:[%s371_s1 + $0x20] sm:$0xff]  }
   0x3   :  { %243 = vmatprep.subr.bf16.mxu0 %v276_v0  ;;  %v268_v6 = vld [vmem:[%s371_s1 + $0x28] sm:$0xff]   ;;  %v269_v7 = vld [vmem:[%s371_s1 + $0x30] sm:$0xff]   ;;  %v270_v8 = vld [vmem:[%s371_s1 + $0x38] sm:$0xff]  }
   0x4   :  { %v271_v9 = vld [vmem:[%s372_s0] sm:$0xff]   ;;  %v166_v23 = vld [vmem:[%s374_s3 + $0x8] sm:$0xff] }
   0x5   :  { %v229_v18 = vld [vmem:[%s373_s2] ss:$0 sm:$0xff] }
   0x6   :  { %244 = vmatpush3.bf16.msra.mxu0 %v264_v2  ;;  %v165_v20 = vld [vmem:[%s374_s3] sm:$0xff] }
   0x7   :  { %245 = vmatprep.subr.bf16.mxu0 %v276_v0  ;;  %v230_v46 = vld [vmem:[%s375_s4] ss:$0 sm:$0xff] }
   0x8   :  { %v31_v10 = vld [vmem:[#allocation2] sm:$0xff]  ;;  %v32_v12 = vld [vmem:[#allocation2 + $0x8] sm:$0xff] }
   0x9   :  { %v231_v48 = vld [vmem:[%s376_s5] ss:$0 sm:$0xff] }
   0xa   :  { %246 = vmatpush3.bf16.msra.mxu0 %v265_v3 }
   0xb   :  { %247 = vmatprep.subr.bf16.mxu0 %v276_v0 }
   0xe   :  { %248 = vmatpush3.bf16.msra.mxu0 %v266_v4 }
   0xf   :  { %249 = vmatprep.subr.bf16.mxu0 %v276_v0 }
  0x12   :  { %250 = vmatpush3.bf16.msra.mxu0 %v267_v5 }
  0x13   :  { %251 = vmatprep.subr.bf16.mxu0 %v276_v0 }
  0x16   :  { %252 = vmatpush3.bf16.msra.mxu0 %v268_v6 }
  0x17   :  { %253 = vmatprep.subr.bf16.mxu0 %v276_v0 }
  0x1a   :  { %254 = vmatpush3.bf16.msra.mxu0 %v269_v7 }
  0x1b   :  { %255 = vmatprep.subr.bf16.mxu0 %v276_v0 }
  0x1e   :  { %256 = vmatpush3.bf16.msra.mxu0 %v270_v8 }
  0x21   :  { %258 = vmatmul.mubr.bf16.vlgmr.msra.gmra.mrb[0].mxu0 %v271_v9 }
  0xf4   :  { %v139_v11 = vpop.f32.mrb[0].mxu0 }
  0xf5   :  { %v146_v13 = vadd.f32 %v139_v11, %v31_v10  ;;  %v259_v14 = vpop.f32.mrb[1].mxu0 }
  0xf6   :  { %v142_v15 = vpop.f32.mrb[2].mxu0 }
  0xf7   :  { %149 = vst.msk [vmem:[#allocation2] sm:$0xff] %vm28_vm0, %v146_v13  ;;  %v147_v16 = vadd.f32 %v142_v15, %v32_v12  ;;  %v260_v17 = vpop.f32.mrb[3].mxu0 }
  0xf9   :  { %150 = vst.msk [vmem:[#allocation2 + $0x8] sm:$0xff] %vm28_vm0, %v147_v16 }
  0xfe   :  { %v154_v19 = vld [vmem:[#allocation2] sm:$0xff] }
  0xff   :  { %v163_v21 = vadd.f32 %v229_v18, %v154_v19 }
 0x100   :  { %v155_v22 = vld [vmem:[#allocation2 + $0x8] sm:$0xff] }
 0x101   :  { %v167_v24 = vadd.f32 %v165_v20, %v163_v21  ;;  %v164_v25 = vadd.f32 %v229_v18, %v155_v22 }
 0x103   :  { %v169_v26 = vsel %vm28_vm0, %v167_v24, 0.0  ;;  %v168_v27 = vadd.f32 %v166_v23, %v164_v25 }
 0x104   :  { %170 = vadd.xlane.f32.xlu0 %v169_v26 }
 0x105   :  { %v172_v28 = vsel %vm28_vm0, %v168_v27, 0.0 }
 0x108   :  { %173 = vadd.xlane.f32.xlu0 %v172_v28 }
 0x191   :  { %v171_v29 = vpop.xlane.xlu0 %170 }
 0x192   :  { %v176_v30 = vmul.f32 0.03125, %v171_v29 }
 0x194   :  { %v178_v31 = vsub.f32 %v167_v24, %v176_v30 }
 0x195   :  { %v174_v32 = vpop.xlane.xlu0 %173 }
 0x196   :  { %v177_v33 = vmul.f32 0.03125, %v174_v32  ;;  %v180_v34 = vmul.f32 %v178_v31, %v178_v31 }
 0x198   :  { %v179_v35 = vsub.f32 %v168_v27, %v177_v33  ;;  %v182_v36 = vsel %vm28_vm0, %v180_v34, 0.0 }
 0x199   :  { %183 = vadd.xlane.f32.xlu1 %v182_v36 }
 0x19a   :  { %v181_v37 = vmul.f32 %v179_v35, %v179_v35 }
 0x19c   :  { %v185_v38 = vsel %vm28_vm0, %v181_v37, 0.0 }
 0x19d   :  { %186 = vadd.xlane.f32.xlu1 %v185_v38 }
 0x226   :  { %v184_v39 = vpop.xlane.xlu1 %183 }
 0x227   :  { %v188_v40 = vmul.f32 0.03125, %v184_v39 }
 0x229   :  { %v190_v41 = vadd.f32 1e-05, %v188_v40 }
 0x22a   :  { %v187_v42 = vpop.xlane.xlu1 %186 }
 0x22b   :  { %272 = vrsqrt.f32 %v190_v41  ;;  %v189_v43 = vmul.f32 0.03125, %v187_v42 }
 0x22d   :  { %v191_v44 = vadd.f32 1e-05, %v189_v43 }
 0x22f   :  { %274 = vrsqrt.f32 %v191_v44 }
 0x235   :  { %v273_v45 = vpop.eup %272 }
 0x236   :  { %v194_v47 = vmul.f32 %v273_v45, %v178_v31 }
 0x238   :  { %v203_v49 = vmul.f32 %v230_v46, %v194_v47 }
 0x239   :  { %v275_v50 = vpop.eup %274 }
 0x23a   :  { %v212_v51 = vadd.f32 %v231_v48, %v203_v49  ;;  %v195_v52 = vmul.f32 %v275_v50, %v179_v35 }
 0x23c   :  { %214 = vst.msk [vmem:[%s377_s6] sm:$0xff] %vm28_vm0, %v212_v51  ;;  %v204_v53 = vmul.f32 %v230_v46, %v195_v52 }
 0x23e   :  { %v213_v54 = vadd.f32 %v231_v48, %v204_v53 }
 0x240   :  { %215 = vst.msk [vmem:[%s377_s6 + $0x8] sm:$0xff] %vm28_vm0, %v213_v54 }

</bundles_post_ra>
